<compile_context>
chip_gen: v7x
topology: tpu7x:2x2x1
jax: 0.10.0
libtpu: 0.0.40
codegen_flags: <defaults>
</compile_context>

<pallas_src>
import functools
import numpy as np

import jax
import jax.numpy as jnp
from jax.experimental import pallas as pl
from jax.experimental.pallas import tpu as pltpu

F32 = jnp.float32
BF16 = jnp.bfloat16


# ------------------------------ fused kernel --------------------------------

def _make_fpn_kernel(H, W, C, Nq, L, pk):
    """Whole FPNBlock forward for one batch element per grid step.

    Ref order: x, [w1,b1,w2,b2,ph,pw]*L, mid_w, mid_b, [wd,bd,wc,bc]*L,
               o_ref, [up_pad]*L, [dn_pad]*L.
    """
    n_in = 1 + 6 * L + 2 + 4 * L

    def kernel(*args):
        x_ref = args[0]
        wref = list(args[1:n_in])
        o_ref = args[n_in]
        scratch = args[n_in + 1:]
        up_w = [wref[6 * i:6 * i + 6] for i in range(L)]
        mid_w, mid_b = wref[6 * L], wref[6 * L + 1]
        dn_w = [wref[6 * L + 2 + 4 * i:6 * L + 6 + 4 * i] for i in range(L)]
        up_pads, dn_pads = scratch[:L], scratch[L:]

        def conv3x3(pad, w_ref, rows):
            # 3 MXU pushes over row-shifted bf16 slabs; K = W*C.  Band-clipped
            # weights implement the W-direction 'same' (zero) padding.
            acc = jnp.dot(pad[0:rows, :], w_ref[0], preferred_element_type=F32)
            acc += jnp.dot(pad[1:rows + 1, :], w_ref[1],
                           preferred_element_type=F32)
            acc += jnp.dot(pad[2:rows + 2, :], w_ref[2],
                           preferred_element_type=F32)
            return acc

        # -------- up path: ResGroupBlock (grouped 3x3 x2) + AvgPool2d(2,2) ---
        x = x_ref[0]                                      # (H, W*C) f32
        skips = []
        for i in range(L):
            Hi, Wi = H >> i, W >> i
            w1, b1, w2, b2, ph, pw = up_w[i]
            pad = up_pads[i]                              # (Hi+2, Wi*C) bf16
            pad[0:1, :] = jnp.zeros((1, Wi * C), BF16)    # halo rows only
            pad[Hi + 1:Hi + 2, :] = jnp.zeros((1, Wi * C), BF16)
            pad[1:Hi + 1, :] = x.astype(BF16)             # lane-aligned interior
            y1 = jnp.maximum(conv3x3(pad, w1, Hi) + b1[...], 0.0)  # relu(conv1)
            pad[1:Hi + 1, :] = y1.astype(BF16)            # reuse slab for conv2
            # 0.1*relu(conv2(y1)) + x  (res_scale folded into w2/b2)
            res = jnp.maximum(conv3x3(pad, w2, Hi) + b2[...], 0.0) + x
            skips.append(res)                             # f32, stays on-chip
            # AvgPool2d(2,2): two separable 0.5 matmuls (exact 0.25 average)
            prow = jnp.dot(ph[...], res, preferred_element_type=F32)
            x = jnp.dot(prow, pw[...], preferred_element_type=F32)

        # -------- FPNBlock.conv: 1x1, N -> N/4 (block-diagonal weight) --------
        y = jnp.dot(x.astype(BF16), mid_w[...],
                    preferred_element_type=F32) + mid_b[...]

        # -------- down path: FuseBlock = Upsampler(PixelShuffle 2) + 1x1 skip -
        for i in range(L):
            hi, wi = H >> (L - i), W >> (L - i)           # coarse dims
            Mo = 2 * wi * Nq                              # one fine merged row
            wd, bd, wc, bc = dn_w[i]
            padd = dn_pads[i]                             # (hi+2, wi*Nq) f32
            padd[0:1, :] = jnp.zeros((1, wi * Nq), F32)
            padd[hi + 1:hi + 2, :] = jnp.zeros((1, wi * Nq), F32)
            if i == 0:
                padd[1:hi + 1, :] = y                     # mid-conv output
            # Upsampler 3x3 conv; PixelShuffle(2) folded into the columns:
            # cols [0:Mo) hold fine rows 2r, cols [Mo:2Mo) hold fine rows 2r+1.
            acc = jnp.dot(padd[0:hi, :].astype(BF16), wd[0],
                          preferred_element_type=F32)
            acc += jnp.dot(padd[1:hi + 1, :].astype(BF16), wd[1],
                           preferred_element_type=F32)
            acc += jnp.dot(padd[2:hi + 2, :].astype(BF16), wd[2],
                           preferred_element_type=F32)
            acc += bd[...]
            # 1x1 conv of the skip connection, natural fine-row layout
            skip = skips[L - 1 - i]                       # (2hi, 2wi*C) f32
            c1 = jnp.dot(skip.astype(BF16), wc[...],
                         preferred_element_type=F32) + bc[...]   # (2hi, Mo)
            # fine-row interleave via per-coarse-row stores (no in-kernel
            # reshape); destination = next stage's slab or the output block.
            if i < L - 1:
                dest = dn_pads[i + 1]                     # interior rows 1..2hi
                for r in range(hi):
                    dest[1 + 2 * r:2 + 2 * r, :] = (
                        acc[r:r + 1, 0:Mo] + c1[2 * r:2 * r + 1, :])
                    dest[2 + 2 * r:3 + 2 * r, :] = (
                        acc[r:r + 1, Mo:2 * Mo] + c1[2 * r + 1:2 * r + 2, :])
            else:
                # lane-dense output: pk fine rows packed per stored row
                for r in range(hi):
                    for a in range(2):
                        fr = 2 * r + a
                        q, s = fr // pk, fr % pk
                        o_ref[0, q:q + 1, s * Mo:(s + 1) * Mo] = (
                            acc[r:r + 1, a * Mo:(a + 1) * Mo] + c1[fr:fr + 1, :])

    return kernel


# ------------------------------ pallas_call wrapper -------------------------

def fpn_block_forward(params, x_nhwc, n_layers, n_feats):
    B, H, W, C = x_nhwc.shape
    assert C == n_feats and n_feats % 4 == 0
    L, Nq = n_layers, n_feats // 4
    Wout = W * Nq

    # Pack `pk` fine output rows per stored row so the single HBM store is
    # lane-dense (up to 128-wide); the wrapper reshape back is memory-order.
    pk = 1
    while pk * 2 * Wout <= 128 and H % (pk * 2) == 0:
        pk *= 2

    x = x_nhwc.reshape(B, H, W * C)                     # free: lane-merged NHWC

    def const_spec(arr):
        nd = arr.ndim
        return pl.BlockSpec(arr.shape, lambda b, nd=nd: (0,) * nd)

    inputs = [x]
    in_specs = [pl.BlockSpec((1, H, W * C), lambda b: (b, 0, 0))]
    for i in range(L):
        for k in ("w1", "b1", "w2", "b2", "ph", "pw"):
            a = params["up"][i][k]
            inputs.append(a)
            in_specs.append(const_spec(a))
    for k in ("mid_w", "mid_b"):
        a = params[k]
        inputs.append(a)
        in_specs.append(const_spec(a))
    for i in range(L):
        for k in ("wd", "bd", "wc", "bc"):
            a = params["down"][i][k]
            inputs.append(a)
            in_specs.append(const_spec(a))

    scratch = (
        [pltpu.VMEM(((H >> i) + 2, (W >> i) * C), BF16) for i in range(L)]
        + [pltpu.VMEM(((H >> (L - i)) + 2, (W >> (L - i)) * Nq), F32)
           for i in range(L)])

    out = pl.pallas_call(
        _make_fpn_kernel(H, W, C, Nq, L, pk),
        out_shape=jax.ShapeDtypeStruct((B, H // pk, pk * Wout), F32),
        grid=(B,),
        in_specs=in_specs,
        out_specs=pl.BlockSpec((1, H // pk, pk * Wout), lambda b: (b, 0, 0)),
        scratch_shapes=scratch,
        compiler_params=pltpu.CompilerParams(
            dimension_semantics=("parallel",)),   # one image per TC on v7x
    )(*inputs)
    return out.reshape(B, H, W, Nq)                     # free: back to NHWC


# ------------------------ weight packing (init-time, numpy) -----------------

def _grouped_to_dense_hwio(wg):
    """(G,3,3,Cin_g,Cout_g) grouped weight -> dense block-diagonal HWIO."""
    G, KH, KW, Ci, Co = wg.shape
    dense = np.zeros((KH, KW, G * Ci, G * Co), np.float32)
    for g in range(G):
        dense[:, :, g * Ci:(g + 1) * Ci, g * Co:(g + 1) * Co] = wg[g]
    return dense


def _band_conv3x3(w_hwio, W):
    """HWIO (3,3,Cin,Cout) -> per-kh banded (W*Cin, W*Cout); the W-direction
    'same' zero padding is implemented by clipping the band at the edges."""
    KH, KW, Ci, Co = w_hwio.shape
    out = np.zeros((KH, W * Ci, W * Co), np.float32)
    for kh in range(KH):
        for j in range(W):
            for kw in range(KW):
                p = j + kw - 1
                if 0 <= p < W:
                    out[kh, p * Ci:(p + 1) * Ci, j * Co:(j + 1) * Co] = \
                        w_hwio[kh, kw]
    return out


def _band_upconv_ps2(w_hwio, w):
    """Upsampler conv (3,3,Nq,4*Nq) with PixelShuffle(2) folded into the output
    columns: col a*Mo + (2j+b)*Nq + c = fine pixel (row parity a, fine col
    2j+b, channel c).  Band clipped at the W edges (zero padding)."""
    KH, KW, Ci, C4 = w_hwio.shape
    Nq = C4 // 4
    Mo = 2 * w * Nq
    out = np.zeros((KH, w * Ci, 2 * Mo), np.float32)
    for kh in range(KH):
        for j in range(w):
            for kw in range(KW):
                p = j + kw - 1
                if not 0 <= p < w:
                    continue
                for a in range(2):
                    for b in range(2):
                        for c in range(Nq):
                            col = a * Mo + (2 * j + b) * Nq + c
                            out[kh, p * Ci:(p + 1) * Ci, col] = \
                                w_hwio[kh, kw, :, c * 4 + a * 2 + b]
    return out


def _ps2_bias(b_de, w):
    """Upsampler bias (4*Nq,) laid out to match _band_upconv_ps2 columns."""
    Nq = b_de.shape[0] // 4
    Mo = 2 * w * Nq
    out = np.zeros((1, 2 * Mo), np.float32)
    for a in range(2):
        for j in range(w):
            for b in range(2):
                for c in range(Nq):
                    out[0, a * Mo + (2 * j + b) * Nq + c] = \
                        b_de[c * 4 + a * 2 + b]
    return out


def _tile_bias(b, reps):
    return np.tile(np.asarray(b, np.float32), reps).reshape(1, -1)


def _pool_mats(H, W, C):
    """Separable AvgPool2d(2,2) matrices in the lane-merged layout."""
    H2, W2 = H // 2, W // 2
    ph = np.zeros((H2, H), np.float32)
    for q in range(H2):
        ph[q, 2 * q] = 0.5
        ph[q, 2 * q + 1] = 0.5
    pw = np.zeros((W * C, W2 * C), np.float32)
    for q in range(W2):
        for c in range(C):
            pw[(2 * q) * C + c, q * C + c] = 0.5
            pw[(2 * q + 1) * C + c, q * C + c] = 0.5
    return ph, pw


def init_params(key, n_feats, n_layers, H, W):
    N, Nq = n_feats, n_feats // 4
    keys = iter(jax.random.split(key, 8 * n_layers + 2))

    def nrm(shape, scale=0.1):
        return np.asarray(scale * jax.random.normal(next(keys), shape, F32))

    params = {"up": [], "down": []}
    for i in range(n_layers):                        # ResGroupBlock at H>>i
        Hi, Wi = H >> i, W >> i
        w1 = _grouped_to_dense_hwio(nrm((4, 3, 3, Nq, Nq)))   # groups=4
        b1 = nrm((N,))
        w2 = _grouped_to_dense_hwio(nrm((4, 3, 3, Nq, Nq)))
        b2 = nrm((N,))
        ph, pw = _pool_mats(Hi, Wi, N)
        params["up"].append({
            "w1": jnp.asarray(_band_conv3x3(w1, Wi), BF16),
            "b1": jnp.asarray(_tile_bias(b1, Wi), F32),
            # res_scale=0.1 folded in: relu(0.1*z) == 0.1*relu(z)
            "w2": jnp.asarray(0.1 * _band_conv3x3(w2, Wi), BF16),
            "b2": jnp.asarray(0.1 * _tile_bias(b2, Wi), F32),
            "ph": jnp.asarray(ph, F32),
            "pw": jnp.asarray(pw, F32),
        })
    for i in range(n_layers):                        # FuseBlock, coarse W>>(L-i)
        wc_ = W >> (n_layers - i)
        dw = nrm((3, 3, Nq, 4 * Nq))                 # Upsampler conv (HWIO)
        db = nrm((4 * Nq,))
        cw = nrm((N, Nq))                            # 1x1 skip conv
        cb = nrm((Nq,))
        params["down"].append({
            "wd": jnp.asarray(_band_upconv_ps2(dw, wc_), BF16),
            "bd": jnp.asarray(_ps2_bias(db, wc_), F32),
            # skip 1x1 in natural fine-row layout: fine width = 2*wc_ pixels
            "wc": jnp.asarray(np.kron(np.eye(2 * wc_, dtype=np.float32), cw),
                              BF16),
            "bc": jnp.asarray(_tile_bias(cb, 2 * wc_), F32),
        })
    wm = W >> n_layers                               # FPNBlock.conv (1x1, N->Nq)
    mw = nrm((N, Nq))
    mb = nrm((Nq,))
    params["mid_w"] = jnp.asarray(np.kron(np.eye(wm, dtype=np.float32), mw),
                                  BF16)
    params["mid_b"] = jnp.asarray(_tile_bias(mb, wm), F32)
    return params


# --------------------------------- main --------------------------------------

if __name__ == "__main__":
    key = jax.random.PRNGKey(0)
    k_par, k_x = jax.random.split(key)

    # torch-equivalent input: (B, C, H, W) = (2, 8, 16, 16); ours is NHWC.
    B, n_feats, H, W, n_layers = 2, 8, 16, 16, 2
    params = init_params(k_par, n_feats, n_layers, H, W)
    x = jax.random.normal(k_x, (B, H, W, n_feats), F32)

    fwd = jax.jit(functools.partial(fpn_block_forward,
                                    n_layers=n_layers, n_feats=n_feats))
    out = jax.block_until_ready(fwd(params, x))
    assert out.shape == (B, H, W, n_feats // 4), out.shape
    assert bool(jnp.all(jnp.isfinite(out)))
    print("KERNEL_OK")
</pallas_src>

<mosaic_0001>
module attributes {stable_mosaic.version = 11 : i64} {
  func.func @kernel(%arg0: i32, %arg1: memref<1x16x128xf32, #tpu.memory_space<vmem>>, %arg2: memref<3x128x128xbf16, #tpu.memory_space<vmem>>, %arg3: memref<1x128xf32, #tpu.memory_space<vmem>>, %arg4: memref<3x128x128xbf16, #tpu.memory_space<vmem>>, %arg5: memref<1x128xf32, #tpu.memory_space<vmem>>, %arg6: memref<8x16xf32, #tpu.memory_space<vmem>>, %arg7: memref<128x64xf32, #tpu.memory_space<vmem>>, %arg8: memref<3x64x64xbf16, #tpu.memory_space<vmem>>, %arg9: memref<1x64xf32, #tpu.memory_space<vmem>>, %arg10: memref<3x64x64xbf16, #tpu.memory_space<vmem>>, %arg11: memref<1x64xf32, #tpu.memory_space<vmem>>, %arg12: memref<4x8xf32, #tpu.memory_space<vmem>>, %arg13: memref<64x32xf32, #tpu.memory_space<vmem>>, %arg14: memref<32x8xbf16, #tpu.memory_space<vmem>>, %arg15: memref<1x8xf32, #tpu.memory_space<vmem>>, %arg16: memref<3x8x32xbf16, #tpu.memory_space<vmem>>, %arg17: memref<1x32xf32, #tpu.memory_space<vmem>>, %arg18: memref<64x16xbf16, #tpu.memory_space<vmem>>, %arg19: memref<1x16xf32, #tpu.memory_space<vmem>>, %arg20: memref<3x16x64xbf16, #tpu.memory_space<vmem>>, %arg21: memref<1x64xf32, #tpu.memory_space<vmem>>, %arg22: memref<128x32xbf16, #tpu.memory_space<vmem>>, %arg23: memref<1x32xf32, #tpu.memory_space<vmem>>, %arg24: memref<1x4x128xf32, #tpu.memory_space<vmem>>, %arg25: memref<18x128xbf16, #tpu.memory_space<vmem>>, %arg26: memref<10x64xbf16, #tpu.memory_space<vmem>>, %arg27: memref<6x8xf32, #tpu.memory_space<vmem>>, %arg28: memref<10x16xf32, #tpu.memory_space<vmem>>) attributes {dimension_semantics = [#tpu.dimension_semantics<parallel>], iteration_bounds = array<i64: 2>, scalar_prefetch = 0 : i64, scratch_operands = 4 : i64, tpu.core_type = #tpu.core_type<tc>, window_params = [{transform_indices = @transform_0, window_bounds = array<i64: 1, 16, 128>}, {pipeline_mode = #tpu.pipeline_mode<synchronous>, transform_indices = @transform_1, window_bounds = array<i64: 3, 128, 128>}, {pipeline_mode = #tpu.pipeline_mode<synchronous>, transform_indices = @transform_2, window_bounds = array<i64: 1, 128>}, {pipeline_mode = #tpu.pipeline_mode<synchronous>, transform_indices = @transform_3, window_bounds = array<i64: 3, 128, 128>}, {pipeline_mode = #tpu.pipeline_mode<synchronous>, transform_indices = @transform_4, window_bounds = array<i64: 1, 128>}, {pipeline_mode = #tpu.pipeline_mode<synchronous>, transform_indices = @transform_5, window_bounds = array<i64: 8, 16>}, {pipeline_mode = #tpu.pipeline_mode<synchronous>, transform_indices = @transform_6, window_bounds = array<i64: 128, 64>}, {pipeline_mode = #tpu.pipeline_mode<synchronous>, transform_indices = @transform_7, window_bounds = array<i64: 3, 64, 64>}, {pipeline_mode = #tpu.pipeline_mode<synchronous>, transform_indices = @transform_8, window_bounds = array<i64: 1, 64>}, {pipeline_mode = #tpu.pipeline_mode<synchronous>, transform_indices = @transform_9, window_bounds = array<i64: 3, 64, 64>}, {pipeline_mode = #tpu.pipeline_mode<synchronous>, transform_indices = @transform_10, window_bounds = array<i64: 1, 64>}, {pipeline_mode = #tpu.pipeline_mode<synchronous>, transform_indices = @transform_11, window_bounds = array<i64: 4, 8>}, {pipeline_mode = #tpu.pipeline_mode<synchronous>, transform_indices = @transform_12, window_bounds = array<i64: 64, 32>}, {pipeline_mode = #tpu.pipeline_mode<synchronous>, transform_indices = @transform_13, window_bounds = array<i64: 32, 8>}, {pipeline_mode = #tpu.pipeline_mode<synchronous>, transform_indices = @transform_14, window_bounds = array<i64: 1, 8>}, {pipeline_mode = #tpu.pipeline_mode<synchronous>, transform_indices = @transform_15, window_bounds = array<i64: 3, 8, 32>}, {pipeline_mode = #tpu.pipeline_mode<synchronous>, transform_indices = @transform_16, window_bounds = array<i64: 1, 32>}, {pipeline_mode = #tpu.pipeline_mode<synchronous>, transform_indices = @transform_17, window_bounds = array<i64: 64, 16>}, {pipeline_mode = #tpu.pipeline_mode<synchronous>, transform_indices = @transform_18, window_bounds = array<i64: 1, 16>}, {pipeline_mode = #tpu.pipeline_mode<synchronous>, transform_indices = @transform_19, window_bounds = array<i64: 3, 16, 64>}, {pipeline_mode = #tpu.pipeline_mode<synchronous>, transform_indices = @transform_20, window_bounds = array<i64: 1, 64>}, {pipeline_mode = #tpu.pipeline_mode<synchronous>, transform_indices = @transform_21, window_bounds = array<i64: 128, 32>}, {pipeline_mode = #tpu.pipeline_mode<synchronous>, transform_indices = @transform_22, window_bounds = array<i64: 1, 32>}, {transform_indices = @transform_23, window_bounds = array<i64: 1, 4, 128>}]} {
    %c0 = arith.constant 0 : index
    %c0_0 = arith.constant 0 : index
    %c0_1 = arith.constant 0 : index
    %0 = vector.load %arg1[%c0, %c0_0, %c0_1] : memref<1x16x128xf32, #tpu.memory_space<vmem>>, vector<1x16x128xf32>
    %1 = vector.shape_cast %0 : vector<1x16x128xf32> to vector<16x128xf32>
    %cst = arith.constant 0.000000e+00 : bf16
    %2 = vector.broadcast %cst : bf16 to vector<1x128xbf16>
    %c0_2 = arith.constant 0 : index
    %c0_3 = arith.constant 0 : index
    %3 = vector.load %arg25[%c0_2, %c0_3] : memref<18x128xbf16, #tpu.memory_space<vmem>>, vector<1x128xbf16>
    tpu.vector_store %arg25[%c0_2, %c0_3], %2 {strides = array<i32>} : memref<18x128xbf16, #tpu.memory_space<vmem>>, vector<1x128xbf16>,
    %cst_4 = arith.constant 0.000000e+00 : bf16
    %4 = vector.broadcast %cst_4 : bf16 to vector<1x128xbf16>
    %c17 = arith.constant 17 : index
    %c0_5 = arith.constant 0 : index
    %5 = vector.load %arg25[%c17, %c0_5] : memref<18x128xbf16, #tpu.memory_space<vmem>>, vector<1x128xbf16>
    tpu.vector_store %arg25[%c17, %c0_5], %4 {strides = array<i32>} : memref<18x128xbf16, #tpu.memory_space<vmem>>, vector<1x128xbf16>,
    %6 = arith.truncf %1 : vector<16x128xf32> to vector<16x128xbf16>
    %c1 = arith.constant 1 : index
    %c0_6 = arith.constant 0 : index
    %7 = vector.load %arg25[%c1, %c0_6] : memref<18x128xbf16, #tpu.memory_space<vmem>>, vector<16x128xbf16>
    tpu.vector_store %arg25[%c1, %c0_6], %6 {strides = array<i32>} : memref<18x128xbf16, #tpu.memory_space<vmem>>, vector<16x128xbf16>,
    %c0_7 = arith.constant 0 : index
    %c0_8 = arith.constant 0 : index
    %8 = vector.load %arg25[%c0_7, %c0_8] : memref<18x128xbf16, #tpu.memory_space<vmem>>, vector<16x128xbf16>
    %c0_9 = arith.constant 0 : index
    %c0_10 = arith.constant 0 : index
    %c0_11 = arith.constant 0 : index
    %9 = vector.load %arg2[%c0_9, %c0_10, %c0_11] : memref<3x128x128xbf16, #tpu.memory_space<vmem>>, vector<1x128x128xbf16>
    %10 = vector.shape_cast %9 : vector<1x128x128xbf16> to vector<128x128xbf16>
    %cst_12 = arith.constant dense<0.000000e+00> : vector<16x128xf32>
    %11 = tpu.matmul %8, %10, %cst_12 {dimension_numbers = #tpu.dot_dimension_numbers<[1], [0], [0], [1], [0, 0, 1, 1], [], []>} : vector<16x128xbf16>, vector<128x128xbf16>, vector<16x128xf32> -> vector<16x128xf32>
    %c1_13 = arith.constant 1 : index
    %c0_14 = arith.constant 0 : index
    %12 = vector.load %arg25[%c1_13, %c0_14] : memref<18x128xbf16, #tpu.memory_space<vmem>>, vector<16x128xbf16>
    %c1_15 = arith.constant 1 : index
    %c0_16 = arith.constant 0 : index
    %c0_17 = arith.constant 0 : index
    %13 = vector.load %arg2[%c1_15, %c0_16, %c0_17] : memref<3x128x128xbf16, #tpu.memory_space<vmem>>, vector<1x128x128xbf16>
    %14 = vector.shape_cast %13 : vector<1x128x128xbf16> to vector<128x128xbf16>
    %cst_18 = arith.constant dense<0.000000e+00> : vector<16x128xf32>
    %15 = tpu.matmul %12, %14, %cst_18 {dimension_numbers = #tpu.dot_dimension_numbers<[1], [0], [0], [1], [0, 0, 1, 1], [], []>} : vector<16x128xbf16>, vector<128x128xbf16>, vector<16x128xf32> -> vector<16x128xf32>
    %16 = arith.addf %11, %15 : vector<16x128xf32>
    %c2 = arith.constant 2 : index
    %c0_19 = arith.constant 0 : index
    %17 = vector.load %arg25[%c2, %c0_19] : memref<18x128xbf16, #tpu.memory_space<vmem>>, vector<16x128xbf16>
    %c2_20 = arith.constant 2 : index
    %c0_21 = arith.constant 0 : index
    %c0_22 = arith.constant 0 : index
    %18 = vector.load %arg2[%c2_20, %c0_21, %c0_22] : memref<3x128x128xbf16, #tpu.memory_space<vmem>>, vector<1x128x128xbf16>
    %19 = vector.shape_cast %18 : vector<1x128x128xbf16> to vector<128x128xbf16>
    %cst_23 = arith.constant dense<0.000000e+00> : vector<16x128xf32>
    %20 = tpu.matmul %17, %19, %cst_23 {dimension_numbers = #tpu.dot_dimension_numbers<[1], [0], [0], [1], [0, 0, 1, 1], [], []>} : vector<16x128xbf16>, vector<128x128xbf16>, vector<16x128xf32> -> vector<16x128xf32>
    %21 = arith.addf %16, %20 : vector<16x128xf32>
    %c0_24 = arith.constant 0 : index
    %c0_25 = arith.constant 0 : index
    %22 = vector.load %arg3[%c0_24, %c0_25] : memref<1x128xf32, #tpu.memory_space<vmem>>, vector<1x128xf32>
    %23 = vector.broadcast %22 : vector<1x128xf32> to vector<16x128xf32>
    %24 = arith.addf %21, %23 : vector<16x128xf32>
    %cst_26 = arith.constant 0.000000e+00 : f32
    %25 = vector.broadcast %cst_26 : f32 to vector<16x128xf32>
    %26 = arith.maximumf %24, %25 : vector<16x128xf32>
    %27 = arith.truncf %26 : vector<16x128xf32> to vector<16x128xbf16>
    %c1_27 = arith.constant 1 : index
    %c0_28 = arith.constant 0 : index
    %28 = vector.load %arg25[%c1_27, %c0_28] : memref<18x128xbf16, #tpu.memory_space<vmem>>, vector<16x128xbf16>
    tpu.vector_store %arg25[%c1_27, %c0_28], %27 {strides = array<i32>} : memref<18x128xbf16, #tpu.memory_space<vmem>>, vector<16x128xbf16>,
    %c0_29 = arith.constant 0 : index
    %c0_30 = arith.constant 0 : index
    %29 = vector.load %arg25[%c0_29, %c0_30] : memref<18x128xbf16, #tpu.memory_space<vmem>>, vector<16x128xbf16>
    %c0_31 = arith.constant 0 : index
    %c0_32 = arith.constant 0 : index
    %c0_33 = arith.constant 0 : index
    %30 = vector.load %arg4[%c0_31, %c0_32, %c0_33] : memref<3x128x128xbf16, #tpu.memory_space<vmem>>, vector<1x128x128xbf16>
    %31 = vector.shape_cast %30 : vector<1x128x128xbf16> to vector<128x128xbf16>
    %cst_34 = arith.constant dense<0.000000e+00> : vector<16x128xf32>
    %32 = tpu.matmul %29, %31, %cst_34 {dimension_numbers = #tpu.dot_dimension_numbers<[1], [0], [0], [1], [0, 0, 1, 1], [], []>} : vector<16x128xbf16>, vector<128x128xbf16>, vector<16x128xf32> -> vector<16x128xf32>
    %c1_35 = arith.constant 1 : index
    %c0_36 = arith.constant 0 : index
    %33 = vector.load %arg25[%c1_35, %c0_36] : memref<18x128xbf16, #tpu.memory_space<vmem>>, vector<16x128xbf16>
    %c1_37 = arith.constant 1 : index
    %c0_38 = arith.constant 0 : index
    %c0_39 = arith.constant 0 : index
    %34 = vector.load %arg4[%c1_37, %c0_38, %c0_39] : memref<3x128x128xbf16, #tpu.memory_space<vmem>>, vector<1x128x128xbf16>
    %35 = vector.shape_cast %34 : vector<1x128x128xbf16> to vector<128x128xbf16>
    %cst_40 = arith.constant dense<0.000000e+00> : vector<16x128xf32>
    %36 = tpu.matmul %33, %35, %cst_40 {dimension_numbers = #tpu.dot_dimension_numbers<[1], [0], [0], [1], [0, 0, 1, 1], [], []>} : vector<16x128xbf16>, vector<128x128xbf16>, vector<16x128xf32> -> vector<16x128xf32>
    %37 = arith.addf %32, %36 : vector<16x128xf32>
    %c2_41 = arith.constant 2 : index
    %c0_42 = arith.constant 0 : index
    %38 = vector.load %arg25[%c2_41, %c0_42] : memref<18x128xbf16, #tpu.memory_space<vmem>>, vector<16x128xbf16>
    %c2_43 = arith.constant 2 : index
    %c0_44 = arith.constant 0 : index
    %c0_45 = arith.constant 0 : index
    %39 = vector.load %arg4[%c2_43, %c0_44, %c0_45] : memref<3x128x128xbf16, #tpu.memory_space<vmem>>, vector<1x128x128xbf16>
    %40 = vector.shape_cast %39 : vector<1x128x128xbf16> to vector<128x128xbf16>
    %cst_46 = arith.constant dense<0.000000e+00> : vector<16x128xf32>
    %41 = tpu.matmul %38, %40, %cst_46 {dimension_numbers = #tpu.dot_dimension_numbers<[1], [0], [0], [1], [0, 0, 1, 1], [], []>} : vector<16x128xbf16>, vector<128x128xbf16>, vector<16x128xf32> -> vector<16x128xf32>
    %42 = arith.addf %37, %41 : vector<16x128xf32>
    %c0_47 = arith.constant 0 : index
    %c0_48 = arith.constant 0 : index
    %43 = vector.load %arg5[%c0_47, %c0_48] : memref<1x128xf32, #tpu.memory_space<vmem>>, vector<1x128xf32>
    %44 = vector.broadcast %43 : vector<1x128xf32> to vector<16x128xf32>
    %45 = arith.addf %42, %44 : vector<16x128xf32>
    %cst_49 = arith.constant 0.000000e+00 : f32
    %46 = vector.broadcast %cst_49 : f32 to vector<16x128xf32>
    %47 = arith.maximumf %45, %46 : vector<16x128xf32>
    %48 = arith.addf %47, %1 : vector<16x128xf32>
    %c0_50 = arith.constant 0 : index
    %c0_51 = arith.constant 0 : index
    %49 = vector.load %arg6[%c0_50, %c0_51] : memref<8x16xf32, #tpu.memory_space<vmem>>, vector<8x16xf32>
    %cst_52 = arith.constant dense<0.000000e+00> : vector<8x128xf32>
    %50 = tpu.matmul %49, %48, %cst_52 {dimension_numbers = #tpu.dot_dimension_numbers<[1], [0], [0], [1], [0, 0, 1, 1], [], []>} : vector<8x16xf32>, vector<16x128xf32>, vector<8x128xf32> -> vector<8x128xf32>
    %c0_53 = arith.constant 0 : index
    %c0_54 = arith.constant 0 : index
    %51 = vector.load %arg7[%c0_53, %c0_54] : memref<128x64xf32, #tpu.memory_space<vmem>>, vector<128x64xf32>
    %cst_55 = arith.constant dense<0.000000e+00> : vector<8x64xf32>
    %52 = tpu.matmul %50, %51, %cst_55 {dimension_numbers = #tpu.dot_dimension_numbers<[1], [0], [0], [1], [0, 0, 1, 1], [], []>} : vector<8x128xf32>, vector<128x64xf32>, vector<8x64xf32> -> vector<8x64xf32>
    %cst_56 = arith.constant 0.000000e+00 : bf16
    %53 = vector.broadcast %cst_56 : bf16 to vector<1x64xbf16>
    %c0_57 = arith.constant 0 : index
    %c0_58 = arith.constant 0 : index
    %54 = vector.load %arg26[%c0_57, %c0_58] : memref<10x64xbf16, #tpu.memory_space<vmem>>, vector<1x64xbf16>
    tpu.vector_store %arg26[%c0_57, %c0_58], %53 {strides = array<i32>} : memref<10x64xbf16, #tpu.memory_space<vmem>>, vector<1x64xbf16>,
    %cst_59 = arith.constant 0.000000e+00 : bf16
    %55 = vector.broadcast %cst_59 : bf16 to vector<1x64xbf16>
    %c9 = arith.constant 9 : index
    %c0_60 = arith.constant 0 : index
    %56 = vector.load %arg26[%c9, %c0_60] : memref<10x64xbf16, #tpu.memory_space<vmem>>, vector<1x64xbf16>
    tpu.vector_store %arg26[%c9, %c0_60], %55 {strides = array<i32>} : memref<10x64xbf16, #tpu.memory_space<vmem>>, vector<1x64xbf16>,
    %57 = arith.truncf %52 : vector<8x64xf32> to vector<8x64xbf16>
    %c1_61 = arith.constant 1 : index
    %c0_62 = arith.constant 0 : index
    %58 = vector.load %arg26[%c1_61, %c0_62] : memref<10x64xbf16, #tpu.memory_space<vmem>>, vector<8x64xbf16>
    tpu.vector_store %arg26[%c1_61, %c0_62], %57 {strides = array<i32>} : memref<10x64xbf16, #tpu.memory_space<vmem>>, vector<8x64xbf16>,
    %c0_63 = arith.constant 0 : index
    %c0_64 = arith.constant 0 : index
    %59 = vector.load %arg26[%c0_63, %c0_64] : memref<10x64xbf16, #tpu.memory_space<vmem>>, vector<8x64xbf16>
    %c0_65 = arith.constant 0 : index
    %c0_66 = arith.constant 0 : index
    %c0_67 = arith.constant 0 : index
    %60 = vector.load %arg8[%c0_65, %c0_66, %c0_67] : memref<3x64x64xbf16, #tpu.memory_space<vmem>>, vector<1x64x64xbf16>
    %61 = vector.shape_cast %60 : vector<1x64x64xbf16> to vector<64x64xbf16>
    %cst_68 = arith.constant dense<0.000000e+00> : vector<8x64xf32>
    %62 = tpu.matmul %59, %61, %cst_68 {dimension_numbers = #tpu.dot_dimension_numbers<[1], [0], [0], [1], [0, 0, 1, 1], [], []>} : vector<8x64xbf16>, vector<64x64xbf16>, vector<8x64xf32> -> vector<8x64xf32>
    %c1_69 = arith.constant 1 : index
    %c0_70 = arith.constant 0 : index
    %63 = vector.load %arg26[%c1_69, %c0_70] : memref<10x64xbf16, #tpu.memory_space<vmem>>, vector<8x64xbf16>
    %c1_71 = arith.constant 1 : index
    %c0_72 = arith.constant 0 : index
    %c0_73 = arith.constant 0 : index
    %64 = vector.load %arg8[%c1_71, %c0_72, %c0_73] : memref<3x64x64xbf16, #tpu.memory_space<vmem>>, vector<1x64x64xbf16>
    %65 = vector.shape_cast %64 : vector<1x64x64xbf16> to vector<64x64xbf16>
    %cst_74 = arith.constant dense<0.000000e+00> : vector<8x64xf32>
    %66 = tpu.matmul %63, %65, %cst_74 {dimension_numbers = #tpu.dot_dimension_numbers<[1], [0], [0], [1], [0, 0, 1, 1], [], []>} : vector<8x64xbf16>, vector<64x64xbf16>, vector<8x64xf32> -> vector<8x64xf32>
    %67 = arith.addf %62, %66 : vector<8x64xf32>
    %c2_75 = arith.constant 2 : index
    %c0_76 = arith.constant 0 : index
    %68 = vector.load %arg26[%c2_75, %c0_76] : memref<10x64xbf16, #tpu.memory_space<vmem>>, vector<8x64xbf16>
    %c2_77 = arith.constant 2 : index
    %c0_78 = arith.constant 0 : index
    %c0_79 = arith.constant 0 : index
    %69 = vector.load %arg8[%c2_77, %c0_78, %c0_79] : memref<3x64x64xbf16, #tpu.memory_space<vmem>>, vector<1x64x64xbf16>
    %70 = vector.shape_cast %69 : vector<1x64x64xbf16> to vector<64x64xbf16>
    %cst_80 = arith.constant dense<0.000000e+00> : vector<8x64xf32>
    %71 = tpu.matmul %68, %70, %cst_80 {dimension_numbers = #tpu.dot_dimension_numbers<[1], [0], [0], [1], [0, 0, 1, 1], [], []>} : vector<8x64xbf16>, vector<64x64xbf16>, vector<8x64xf32> -> vector<8x64xf32>
    %72 = arith.addf %67, %71 : vector<8x64xf32>
    %c0_81 = arith.constant 0 : index
    %c0_82 = arith.constant 0 : index
    %73 = vector.load %arg9[%c0_81, %c0_82] : memref<1x64xf32, #tpu.memory_space<vmem>>, vector<1x64xf32>
    %74 = vector.broadcast %73 : vector<1x64xf32> to vector<8x64xf32>
    %75 = arith.addf %72, %74 : vector<8x64xf32>
    %cst_83 = arith.constant 0.000000e+00 : f32
    %76 = vector.broadcast %cst_83 : f32 to vector<8x64xf32>
    %77 = arith.maximumf %75, %76 : vector<8x64xf32>
    %78 = arith.truncf %77 : vector<8x64xf32> to vector<8x64xbf16>
    %c1_84 = arith.constant 1 : index
    %c0_85 = arith.constant 0 : index
    %79 = vector.load %arg26[%c1_84, %c0_85] : memref<10x64xbf16, #tpu.memory_space<vmem>>, vector<8x64xbf16>
    tpu.vector_store %arg26[%c1_84, %c0_85], %78 {strides = array<i32>} : memref<10x64xbf16, #tpu.memory_space<vmem>>, vector<8x64xbf16>,
    %c0_86 = arith.constant 0 : index
    %c0_87 = arith.constant 0 : index
    %80 = vector.load %arg26[%c0_86, %c0_87] : memref<10x64xbf16, #tpu.memory_space<vmem>>, vector<8x64xbf16>
    %c0_88 = arith.constant 0 : index
    %c0_89 = arith.constant 0 : index
    %c0_90 = arith.constant 0 : index
    %81 = vector.load %arg10[%c0_88, %c0_89, %c0_90] : memref<3x64x64xbf16, #tpu.memory_space<vmem>>, vector<1x64x64xbf16>
    %82 = vector.shape_cast %81 : vector<1x64x64xbf16> to vector<64x64xbf16>
    %cst_91 = arith.constant dense<0.000000e+00> : vector<8x64xf32>
    %83 = tpu.matmul %80, %82, %cst_91 {dimension_numbers = #tpu.dot_dimension_numbers<[1], [0], [0], [1], [0, 0, 1, 1], [], []>} : vector<8x64xbf16>, vector<64x64xbf16>, vector<8x64xf32> -> vector<8x64xf32>
    %c1_92 = arith.constant 1 : index
    %c0_93 = arith.constant 0 : index
    %84 = vector.load %arg26[%c1_92, %c0_93] : memref<10x64xbf16, #tpu.memory_space<vmem>>, vector<8x64xbf16>
    %c1_94 = arith.constant 1 : index
    %c0_95 = arith.constant 0 : index
    %c0_96 = arith.constant 0 : index
    %85 = vector.load %arg10[%c1_94, %c0_95, %c0_96] : memref<3x64x64xbf16, #tpu.memory_space<vmem>>, vector<1x64x64xbf16>
    %86 = vector.shape_cast %85 : vector<1x64x64xbf16> to vector<64x64xbf16>
    %cst_97 = arith.constant dense<0.000000e+00> : vector<8x64xf32>
    %87 = tpu.matmul %84, %86, %cst_97 {dimension_numbers = #tpu.dot_dimension_numbers<[1], [0], [0], [1], [0, 0, 1, 1], [], []>} : vector<8x64xbf16>, vector<64x64xbf16>, vector<8x64xf32> -> vector<8x64xf32>
    %88 = arith.addf %83, %87 : vector<8x64xf32>
    %c2_98 = arith.constant 2 : index
    %c0_99 = arith.constant 0 : index
    %89 = vector.load %arg26[%c2_98, %c0_99] : memref<10x64xbf16, #tpu.memory_space<vmem>>, vector<8x64xbf16>
    %c2_100 = arith.constant 2 : index
    %c0_101 = arith.constant 0 : index
    %c0_102 = arith.constant 0 : index
    %90 = vector.load %arg10[%c2_100, %c0_101, %c0_102] : memref<3x64x64xbf16, #tpu.memory_space<vmem>>, vector<1x64x64xbf16>
    %91 = vector.shape_cast %90 : vector<1x64x64xbf16> to vector<64x64xbf16>
    %cst_103 = arith.constant dense<0.000000e+00> : vector<8x64xf32>
    %92 = tpu.matmul %89, %91, %cst_103 {dimension_numbers = #tpu.dot_dimension_numbers<[1], [0], [0], [1], [0, 0, 1, 1], [], []>} : vector<8x64xbf16>, vector<64x64xbf16>, vector<8x64xf32> -> vector<8x64xf32>
    %93 = arith.addf %88, %92 : vector<8x64xf32>
    %c0_104 = arith.constant 0 : index
    %c0_105 = arith.constant 0 : index
    %94 = vector.load %arg11[%c0_104, %c0_105] : memref<1x64xf32, #tpu.memory_space<vmem>>, vector<1x64xf32>
    %95 = vector.broadcast %94 : vector<1x64xf32> to vector<8x64xf32>
    %96 = arith.addf %93, %95 : vector<8x64xf32>
    %cst_106 = arith.constant 0.000000e+00 : f32
    %97 = vector.broadcast %cst_106 : f32 to vector<8x64xf32>
    %98 = arith.maximumf %96, %97 : vector<8x64xf32>
    %99 = arith.addf %98, %52 : vector<8x64xf32>
    %c0_107 = arith.constant 0 : index
    %c0_108 = arith.constant 0 : index
    %100 = vector.load %arg12[%c0_107, %c0_108] : memref<4x8xf32, #tpu.memory_space<vmem>>, vector<4x8xf32>
    %cst_109 = arith.constant dense<0.000000e+00> : vector<4x64xf32>
    %101 = tpu.matmul %100, %99, %cst_109 {dimension_numbers = #tpu.dot_dimension_numbers<[1], [0], [0], [1], [0, 0, 1, 1], [], []>} : vector<4x8xf32>, vector<8x64xf32>, vector<4x64xf32> -> vector<4x64xf32>
    %c0_110 = arith.constant 0 : index
    %c0_111 = arith.constant 0 : index
    %102 = vector.load %arg13[%c0_110, %c0_111] : memref<64x32xf32, #tpu.memory_space<vmem>>, vector<64x32xf32>
    %cst_112 = arith.constant dense<0.000000e+00> : vector<4x32xf32>
    %103 = tpu.matmul %101, %102, %cst_112 {dimension_numbers = #tpu.dot_dimension_numbers<[1], [0], [0], [1], [0, 0, 1, 1], [], []>} : vector<4x64xf32>, vector<64x32xf32>, vector<4x32xf32> -> vector<4x32xf32>
    %104 = arith.truncf %103 : vector<4x32xf32> to vector<4x32xbf16>
    %c0_113 = arith.constant 0 : index
    %c0_114 = arith.constant 0 : index
    %105 = vector.load %arg14[%c0_113, %c0_114] : memref<32x8xbf16, #tpu.memory_space<vmem>>, vector<32x8xbf16>
    %cst_115 = arith.constant dense<0.000000e+00> : vector<4x8xf32>
    %106 = tpu.matmul %104, %105, %cst_115 {dimension_numbers = #tpu.dot_dimension_numbers<[1], [0], [0], [1], [0, 0, 1, 1], [], []>} : vector<4x32xbf16>, vector<32x8xbf16>, vector<4x8xf32> -> vector<4x8xf32>
    %c0_116 = arith.constant 0 : index
    %c0_117 = arith.constant 0 : index
    %107 = vector.load %arg15[%c0_116, %c0_117] : memref<1x8xf32, #tpu.memory_space<vmem>>, vector<1x8xf32>
    %108 = vector.broadcast %107 : vector<1x8xf32> to vector<4x8xf32>
    %109 = arith.addf %106, %108 : vector<4x8xf32>
    %cst_118 = arith.constant 0.000000e+00 : f32
    %110 = vector.broadcast %cst_118 : f32 to vector<1x8xf32>
    %c0_119 = arith.constant 0 : index
    %c0_120 = arith.constant 0 : index
    %111 = vector.load %arg27[%c0_119, %c0_120] : memref<6x8xf32, #tpu.memory_space<vmem>>, vector<1x8xf32>
    tpu.vector_store %arg27[%c0_119, %c0_120], %110 {strides = array<i32>} : memref<6x8xf32, #tpu.memory_space<vmem>>, vector<1x8xf32>,
    %cst_121 = arith.constant 0.000000e+00 : f32
    %112 = vector.broadcast %cst_121 : f32 to vector<1x8xf32>
    %c5 = arith.constant 5 : index
    %c0_122 = arith.constant 0 : index
    %113 = vector.load %arg27[%c5, %c0_122] : memref<6x8xf32, #tpu.memory_space<vmem>>, vector<1x8xf32>
    tpu.vector_store %arg27[%c5, %c0_122], %112 {strides = array<i32>} : memref<6x8xf32, #tpu.memory_space<vmem>>, vector<1x8xf32>,
    %c1_123 = arith.constant 1 : index
    %c0_124 = arith.constant 0 : index
    %114 = vector.load %arg27[%c1_123, %c0_124] : memref<6x8xf32, #tpu.memory_space<vmem>>, vector<4x8xf32>
    tpu.vector_store %arg27[%c1_123, %c0_124], %109 {strides = array<i32>} : memref<6x8xf32, #tpu.memory_space<vmem>>, vector<4x8xf32>,
    %c0_125 = arith.constant 0 : index
    %c0_126 = arith.constant 0 : index
    %115 = vector.load %arg27[%c0_125, %c0_126] : memref<6x8xf32, #tpu.memory_space<vmem>>, vector<4x8xf32>
    %116 = arith.truncf %115 : vector<4x8xf32> to vector<4x8xbf16>
    %c0_127 = arith.constant 0 : index
    %c0_128 = arith.constant 0 : index
    %c0_129 = arith.constant 0 : index
    %117 = vector.load %arg16[%c0_127, %c0_128, %c0_129] : memref<3x8x32xbf16, #tpu.memory_space<vmem>>, vector<1x8x32xbf16>
    %118 = vector.shape_cast %117 : vector<1x8x32xbf16> to vector<8x32xbf16>
    %cst_130 = arith.constant dense<0.000000e+00> : vector<4x32xf32>
    %119 = tpu.matmul %116, %118, %cst_130 {dimension_numbers = #tpu.dot_dimension_numbers<[1], [0], [0], [1], [0, 0, 1, 1], [], []>} : vector<4x8xbf16>, vector<8x32xbf16>, vector<4x32xf32> -> vector<4x32xf32>
    %c1_131 = arith.constant 1 : index
    %c0_132 = arith.constant 0 : index
    %120 = vector.load %arg27[%c1_131, %c0_132] : memref<6x8xf32, #tpu.memory_space<vmem>>, vector<4x8xf32>
    %121 = arith.truncf %120 : vector<4x8xf32> to vector<4x8xbf16>
    %c1_133 = arith.constant 1 : index
    %c0_134 = arith.constant 0 : index
    %c0_135 = arith.constant 0 : index
    %122 = vector.load %arg16[%c1_133, %c0_134, %c0_135] : memref<3x8x32xbf16, #tpu.memory_space<vmem>>, vector<1x8x32xbf16>
    %123 = vector.shape_cast %122 : vector<1x8x32xbf16> to vector<8x32xbf16>
    %cst_136 = arith.constant dense<0.000000e+00> : vector<4x32xf32>
    %124 = tpu.matmul %121, %123, %cst_136 {dimension_numbers = #tpu.dot_dimension_numbers<[1], [0], [0], [1], [0, 0, 1, 1], [], []>} : vector<4x8xbf16>, vector<8x32xbf16>, vector<4x32xf32> -> vector<4x32xf32>
    %125 = arith.addf %119, %124 : vector<4x32xf32>
    %c2_137 = arith.constant 2 : index
    %c0_138 = arith.constant 0 : index
    %126 = vector.load %arg27[%c2_137, %c0_138] : memref<6x8xf32, #tpu.memory_space<vmem>>, vector<4x8xf32>
    %127 = arith.truncf %126 : vector<4x8xf32> to vector<4x8xbf16>
    %c2_139 = arith.constant 2 : index
    %c0_140 = arith.constant 0 : index
    %c0_141 = arith.constant 0 : index
    %128 = vector.load %arg16[%c2_139, %c0_140, %c0_141] : memref<3x8x32xbf16, #tpu.memory_space<vmem>>, vector<1x8x32xbf16>
    %129 = vector.shape_cast %128 : vector<1x8x32xbf16> to vector<8x32xbf16>
    %cst_142 = arith.constant dense<0.000000e+00> : vector<4x32xf32>
    %130 = tpu.matmul %127, %129, %cst_142 {dimension_numbers = #tpu.dot_dimension_numbers<[1], [0], [0], [1], [0, 0, 1, 1], [], []>} : vector<4x8xbf16>, vector<8x32xbf16>, vector<4x32xf32> -> vector<4x32xf32>
    %131 = arith.addf %125, %130 : vector<4x32xf32>
    %c0_143 = arith.constant 0 : index
    %c0_144 = arith.constant 0 : index
    %132 = vector.load %arg17[%c0_143, %c0_144] : memref<1x32xf32, #tpu.memory_space<vmem>>, vector<1x32xf32>
    %133 = vector.broadcast %132 : vector<1x32xf32> to vector<4x32xf32>
    %134 = arith.addf %131, %133 : vector<4x32xf32>
    %135 = arith.truncf %99 : vector<8x64xf32> to vector<8x64xbf16>
    %c0_145 = arith.constant 0 : index
    %c0_146 = arith.constant 0 : index
    %136 = vector.load %arg18[%c0_145, %c0_146] : memref<64x16xbf16, #tpu.memory_space<vmem>>, vector<64x16xbf16>
    %cst_147 = arith.constant dense<0.000000e+00> : vector<8x16xf32>
    %137 = tpu.matmul %135, %136, %cst_147 {dimension_numbers = #tpu.dot_dimension_numbers<[1], [0], [0], [1], [0, 0, 1, 1], [], []>} : vector<8x64xbf16>, vector<64x16xbf16>, vector<8x16xf32> -> vector<8x16xf32>
    %c0_148 = arith.constant 0 : index
    %c0_149 = arith.constant 0 : index
    %138 = vector.load %arg19[%c0_148, %c0_149] : memref<1x16xf32, #tpu.memory_space<vmem>>, vector<1x16xf32>
    %139 = vector.broadcast %138 : vector<1x16xf32> to vector<8x16xf32>
    %140 = arith.addf %137, %139 : vector<8x16xf32>
    %141 = vector.extract_strided_slice %134 {offsets = [0, 0], sizes = [1, 16], strides = [1, 1]} : vector<4x32xf32> to vector<1x16xf32>
    %142 = vector.extract_strided_slice %140 {offsets = [0, 0], sizes = [1, 16], strides = [1, 1]} : vector<8x16xf32> to vector<1x16xf32>
    %143 = arith.addf %141, %142 : vector<1x16xf32>
    %c1_150 = arith.constant 1 : index
    %c0_151 = arith.constant 0 : index
    %144 = vector.load %arg28[%c1_150, %c0_151] : memref<10x16xf32, #tpu.memory_space<vmem>>, vector<1x16xf32>
    tpu.vector_store %arg28[%c1_150, %c0_151], %143 {strides = array<i32>} : memref<10x16xf32, #tpu.memory_space<vmem>>, vector<1x16xf32>,
    %145 = vector.extract_strided_slice %134 {offsets = [0, 16], sizes = [1, 16], strides = [1, 1]} : vector<4x32xf32> to vector<1x16xf32>
    %146 = vector.extract_strided_slice %140 {offsets = [1, 0], sizes = [1, 16], strides = [1, 1]} : vector<8x16xf32> to vector<1x16xf32>
    %147 = arith.addf %145, %146 : vector<1x16xf32>
    %c2_152 = arith.constant 2 : index
    %c0_153 = arith.constant 0 : index
    %148 = vector.load %arg28[%c2_152, %c0_153] : memref<10x16xf32, #tpu.memory_space<vmem>>, vector<1x16xf32>
    tpu.vector_store %arg28[%c2_152, %c0_153], %147 {strides = array<i32>} : memref<10x16xf32, #tpu.memory_space<vmem>>, vector<1x16xf32>,
    %149 = vector.extract_strided_slice %134 {offsets = [1, 0], sizes = [1, 16], strides = [1, 1]} : vector<4x32xf32> to vector<1x16xf32>
    %150 = vector.extract_strided_slice %140 {offsets = [2, 0], sizes = [1, 16], strides = [1, 1]} : vector<8x16xf32> to vector<1x16xf32>
    %151 = arith.addf %149, %150 : vector<1x16xf32>
    %c3 = arith.constant 3 : index
    %c0_154 = arith.constant 0 : index
    %152 = vector.load %arg28[%c3, %c0_154] : memref<10x16xf32, #tpu.memory_space<vmem>>, vector<1x16xf32>
    tpu.vector_store %arg28[%c3, %c0_154], %151 {strides = array<i32>} : memref<10x16xf32, #tpu.memory_space<vmem>>, vector<1x16xf32>,
    %153 = vector.extract_strided_slice %134 {offsets = [1, 16], sizes = [1, 16], strides = [1, 1]} : vector<4x32xf32> to vector<1x16xf32>
    %154 = vector.extract_strided_slice %140 {offsets = [3, 0], sizes = [1, 16], strides = [1, 1]} : vector<8x16xf32> to vector<1x16xf32>
    %155 = arith.addf %153, %154 : vector<1x16xf32>
    %c4 = arith.constant 4 : index
    %c0_155 = arith.constant 0 : index
    %156 = vector.load %arg28[%c4, %c0_155] : memref<10x16xf32, #tpu.memory_space<vmem>>, vector<1x16xf32>
    tpu.vector_store %arg28[%c4, %c0_155], %155 {strides = array<i32>} : memref<10x16xf32, #tpu.memory_space<vmem>>, vector<1x16xf32>,
    %157 = vector.extract_strided_slice %134 {offsets = [2, 0], sizes = [1, 16], strides = [1, 1]} : vector<4x32xf32> to vector<1x16xf32>
    %158 = vector.extract_strided_slice %140 {offsets = [4, 0], sizes = [1, 16], strides = [1, 1]} : vector<8x16xf32> to vector<1x16xf32>
    %159 = arith.addf %157, %158 : vector<1x16xf32>
    %c5_156 = arith.constant 5 : index
    %c0_157 = arith.constant 0 : index
    %160 = vector.load %arg28[%c5_156, %c0_157] : memref<10x16xf32, #tpu.memory_space<vmem>>, vector<1x16xf32>
    tpu.vector_store %arg28[%c5_156, %c0_157], %159 {strides = array<i32>} : memref<10x16xf32, #tpu.memory_space<vmem>>, vector<1x16xf32>,
    %161 = vector.extract_strided_slice %134 {offsets = [2, 16], sizes = [1, 16], strides = [1, 1]} : vector<4x32xf32> to vector<1x16xf32>
    %162 = vector.extract_strided_slice %140 {offsets = [5, 0], sizes = [1, 16], strides = [1, 1]} : vector<8x16xf32> to vector<1x16xf32>
    %163 = arith.addf %161, %162 : vector<1x16xf32>
    %c6 = arith.constant 6 : index
    %c0_158 = arith.constant 0 : index
    %164 = vector.load %arg28[%c6, %c0_158] : memref<10x16xf32, #tpu.memory_space<vmem>>, vector<1x16xf32>
    tpu.vector_store %arg28[%c6, %c0_158], %163 {strides = array<i32>} : memref<10x16xf32, #tpu.memory_space<vmem>>, vector<1x16xf32>,
    %165 = vector.extract_strided_slice %134 {offsets = [3, 0], sizes = [1, 16], strides = [1, 1]} : vector<4x32xf32> to vector<1x16xf32>
    %166 = vector.extract_strided_slice %140 {offsets = [6, 0], sizes = [1, 16], strides = [1, 1]} : vector<8x16xf32> to vector<1x16xf32>
    %167 = arith.addf %165, %166 : vector<1x16xf32>
    %c7 = arith.constant 7 : index
    %c0_159 = arith.constant 0 : index
    %168 = vector.load %arg28[%c7, %c0_159] : memref<10x16xf32, #tpu.memory_space<vmem>>, vector<1x16xf32>
    tpu.vector_store %arg28[%c7, %c0_159], %167 {strides = array<i32>} : memref<10x16xf32, #tpu.memory_space<vmem>>, vector<1x16xf32>,
    %169 = vector.extract_strided_slice %134 {offsets = [3, 16], sizes = [1, 16], strides = [1, 1]} : vector<4x32xf32> to vector<1x16xf32>
    %170 = vector.extract_strided_slice %140 {offsets = [7, 0], sizes = [1, 16], strides = [1, 1]} : vector<8x16xf32> to vector<1x16xf32>
    %171 = arith.addf %169, %170 : vector<1x16xf32>
    %c8 = arith.constant 8 : index
    %c0_160 = arith.constant 0 : index
    %172 = vector.load %arg28[%c8, %c0_160] : memref<10x16xf32, #tpu.memory_space<vmem>>, vector<1x16xf32>
    tpu.vector_store %arg28[%c8, %c0_160], %171 {strides = array<i32>} : memref<10x16xf32, #tpu.memory_space<vmem>>, vector<1x16xf32>,
    %cst_161 = arith.constant 0.000000e+00 : f32
    %173 = vector.broadcast %cst_161 : f32 to vector<1x16xf32>
    %c0_162 = arith.constant 0 : index
    %c0_163 = arith.constant 0 : index
    %174 = vector.load %arg28[%c0_162, %c0_163] : memref<10x16xf32, #tpu.memory_space<vmem>>, vector<1x16xf32>
    tpu.vector_store %arg28[%c0_162, %c0_163], %173 {strides = array<i32>} : memref<10x16xf32, #tpu.memory_space<vmem>>, vector<1x16xf32>,
    %cst_164 = arith.constant 0.000000e+00 : f32
    %175 = vector.broadcast %cst_164 : f32 to vector<1x16xf32>
    %c9_165 = arith.constant 9 : index
    %c0_166 = arith.constant 0 : index
    %176 = vector.load %arg28[%c9_165, %c0_166] : memref<10x16xf32, #tpu.memory_space<vmem>>, vector<1x16xf32>
    tpu.vector_store %arg28[%c9_165, %c0_166], %175 {strides = array<i32>} : memref<10x16xf32, #tpu.memory_space<vmem>>, vector<1x16xf32>,
    %c0_167 = arith.constant 0 : index
    %c0_168 = arith.constant 0 : index
    %177 = vector.load %arg28[%c0_167, %c0_168] : memref<10x16xf32, #tpu.memory_space<vmem>>, vector<8x16xf32>
    %178 = arith.truncf %177 : vector<8x16xf32> to vector<8x16xbf16>
    %c0_169 = arith.constant 0 : index
    %c0_170 = arith.constant 0 : index
    %c0_171 = arith.constant 0 : index
    %179 = vector.load %arg20[%c0_169, %c0_170, %c0_171] : memref<3x16x64xbf16, #tpu.memory_space<vmem>>, vector<1x16x64xbf16>
    %180 = vector.shape_cast %179 : vector<1x16x64xbf16> to vector<16x64xbf16>
    %cst_172 = arith.constant dense<0.000000e+00> : vector<8x64xf32>
    %181 = tpu.matmul %178, %180, %cst_172 {dimension_numbers = #tpu.dot_dimension_numbers<[1], [0], [0], [1], [0, 0, 1, 1], [], []>} : vector<8x16xbf16>, vector<16x64xbf16>, vector<8x64xf32> -> vector<8x64xf32>
    %c1_173 = arith.constant 1 : index
    %c0_174 = arith.constant 0 : index
    %182 = vector.load %arg28[%c1_173, %c0_174] : memref<10x16xf32, #tpu.memory_space<vmem>>, vector<8x16xf32>
    %183 = arith.truncf %182 : vector<8x16xf32> to vector<8x16xbf16>
    %c1_175 = arith.constant 1 : index
    %c0_176 = arith.constant 0 : index
    %c0_177 = arith.constant 0 : index
    %184 = vector.load %arg20[%c1_175, %c0_176, %c0_177] : memref<3x16x64xbf16, #tpu.memory_space<vmem>>, vector<1x16x64xbf16>
    %185 = vector.shape_cast %184 : vector<1x16x64xbf16> to vector<16x64xbf16>
    %cst_178 = arith.constant dense<0.000000e+00> : vector<8x64xf32>
    %186 = tpu.matmul %183, %185, %cst_178 {dimension_numbers = #tpu.dot_dimension_numbers<[1], [0], [0], [1], [0, 0, 1, 1], [], []>} : vector<8x16xbf16>, vector<16x64xbf16>, vector<8x64xf32> -> vector<8x64xf32>
    %187 = arith.addf %181, %186 : vector<8x64xf32>
    %c2_179 = arith.constant 2 : index
    %c0_180 = arith.constant 0 : index
    %188 = vector.load %arg28[%c2_179, %c0_180] : memref<10x16xf32, #tpu.memory_space<vmem>>, vector<8x16xf32>
    %189 = arith.truncf %188 : vector<8x16xf32> to vector<8x16xbf16>
    %c2_181 = arith.constant 2 : index
    %c0_182 = arith.constant 0 : index
    %c0_183 = arith.constant 0 : index
    %190 = vector.load %arg20[%c2_181, %c0_182, %c0_183] : memref<3x16x64xbf16, #tpu.memory_space<vmem>>, vector<1x16x64xbf16>
    %191 = vector.shape_cast %190 : vector<1x16x64xbf16> to vector<16x64xbf16>
    %cst_184 = arith.constant dense<0.000000e+00> : vector<8x64xf32>
    %192 = tpu.matmul %189, %191, %cst_184 {dimension_numbers = #tpu.dot_dimension_numbers<[1], [0], [0], [1], [0, 0, 1, 1], [], []>} : vector<8x16xbf16>, vector<16x64xbf16>, vector<8x64xf32> -> vector<8x64xf32>
    %193 = arith.addf %187, %192 : vector<8x64xf32>
    %c0_185 = arith.constant 0 : index
    %c0_186 = arith.constant 0 : index
    %194 = vector.load %arg21[%c0_185, %c0_186] : memref<1x64xf32, #tpu.memory_space<vmem>>, vector<1x64xf32>
    %195 = vector.broadcast %194 : vector<1x64xf32> to vector<8x64xf32>
    %196 = arith.addf %193, %195 : vector<8x64xf32>
    %197 = arith.truncf %48 : vector<16x128xf32> to vector<16x128xbf16>
    %c0_187 = arith.constant 0 : index
    %c0_188 = arith.constant 0 : index
    %198 = vector.load %arg22[%c0_187, %c0_188] : memref<128x32xbf16, #tpu.memory_space<vmem>>, vector<128x32xbf16>
    %cst_189 = arith.constant dense<0.000000e+00> : vector<16x32xf32>
    %199 = tpu.matmul %197, %198, %cst_189 {dimension_numbers = #tpu.dot_dimension_numbers<[1], [0], [0], [1], [0, 0, 1, 1], [], []>} : vector<16x128xbf16>, vector<128x32xbf16>, vector<16x32xf32> -> vector<16x32xf32>
    %c0_190 = arith.constant 0 : index
    %c0_191 = arith.constant 0 : index
    %200 = vector.load %arg23[%c0_190, %c0_191] : memref<1x32xf32, #tpu.memory_space<vmem>>, vector<1x32xf32>
    %201 = vector.broadcast %200 : vector<1x32xf32> to vector<16x32xf32>
    %202 = arith.addf %199, %201 : vector<16x32xf32>
    %203 = vector.extract_strided_slice %196 {offsets = [0, 0], sizes = [1, 32], strides = [1, 1]} : vector<8x64xf32> to vector<1x32xf32>
    %204 = vector.extract_strided_slice %202 {offsets = [0, 0], sizes = [1, 32], strides = [1, 1]} : vector<16x32xf32> to vector<1x32xf32>
    %205 = arith.addf %203, %204 : vector<1x32xf32>
    %c0_192 = arith.constant 0 : index
    %c0_193 = arith.constant 0 : index
    %c0_194 = arith.constant 0 : index
    %206 = vector.load %arg24[%c0_192, %c0_193, %c0_194] : memref<1x4x128xf32, #tpu.memory_space<vmem>>, vector<1x1x32xf32>
    %207 = vector.shape_cast %206 : vector<1x1x32xf32> to vector<1x32xf32>
    %208 = vector.shape_cast %205 : vector<1x32xf32> to vector<1x1x32xf32>
    tpu.vector_store %arg24[%c0_192, %c0_193, %c0_194], %208 {strides = array<i32>} : memref<1x4x128xf32, #tpu.memory_space<vmem>>, vector<1x1x32xf32>,
    %209 = vector.extract_strided_slice %196 {offsets = [0, 32], sizes = [1, 32], strides = [1, 1]} : vector<8x64xf32> to vector<1x32xf32>
    %210 = vector.extract_strided_slice %202 {offsets = [1, 0], sizes = [1, 32], strides = [1, 1]} : vector<16x32xf32> to vector<1x32xf32>
    %211 = arith.addf %209, %210 : vector<1x32xf32>
    %c0_195 = arith.constant 0 : index
    %c0_196 = arith.constant 0 : index
    %c32 = arith.constant 32 : index
    %212 = vector.load %arg24[%c0_195, %c0_196, %c32] : memref<1x4x128xf32, #tpu.memory_space<vmem>>, vector<1x1x32xf32>
    %213 = vector.shape_cast %212 : vector<1x1x32xf32> to vector<1x32xf32>
    %214 = vector.shape_cast %211 : vector<1x32xf32> to vector<1x1x32xf32>
    tpu.vector_store %arg24[%c0_195, %c0_196, %c32], %214 {strides = array<i32>} : memref<1x4x128xf32, #tpu.memory_space<vmem>>, vector<1x1x32xf32>,
    %215 = vector.extract_strided_slice %196 {offsets = [1, 0], sizes = [1, 32], strides = [1, 1]} : vector<8x64xf32> to vector<1x32xf32>
    %216 = vector.extract_strided_slice %202 {offsets = [2, 0], sizes = [1, 32], strides = [1, 1]} : vector<16x32xf32> to vector<1x32xf32>
    %217 = arith.addf %215, %216 : vector<1x32xf32>
    %c0_197 = arith.constant 0 : index
    %c0_198 = arith.constant 0 : index
    %c64 = arith.constant 64 : index
    %218 = vector.load %arg24[%c0_197, %c0_198, %c64] : memref<1x4x128xf32, #tpu.memory_space<vmem>>, vector<1x1x32xf32>
    %219 = vector.shape_cast %218 : vector<1x1x32xf32> to vector<1x32xf32>
    %220 = vector.shape_cast %217 : vector<1x32xf32> to vector<1x1x32xf32>
    tpu.vector_store %arg24[%c0_197, %c0_198, %c64], %220 {strides = array<i32>} : memref<1x4x128xf32, #tpu.memory_space<vmem>>, vector<1x1x32xf32>,
    %221 = vector.extract_strided_slice %196 {offsets = [1, 32], sizes = [1, 32], strides = [1, 1]} : vector<8x64xf32> to vector<1x32xf32>
    %222 = vector.extract_strided_slice %202 {offsets = [3, 0], sizes = [1, 32], strides = [1, 1]} : vector<16x32xf32> to vector<1x32xf32>
    %223 = arith.addf %221, %222 : vector<1x32xf32>
    %c0_199 = arith.constant 0 : index
    %c0_200 = arith.constant 0 : index
    %c96 = arith.constant 96 : index
    %224 = vector.load %arg24[%c0_199, %c0_200, %c96] : memref<1x4x128xf32, #tpu.memory_space<vmem>>, vector<1x1x32xf32>
    %225 = vector.shape_cast %224 : vector<1x1x32xf32> to vector<1x32xf32>
    %226 = vector.shape_cast %223 : vector<1x32xf32> to vector<1x1x32xf32>
    tpu.vector_store %arg24[%c0_199, %c0_200, %c96], %226 {strides = array<i32>} : memref<1x4x128xf32, #tpu.memory_space<vmem>>, vector<1x1x32xf32>,
    %227 = vector.extract_strided_slice %196 {offsets = [2, 0], sizes = [1, 32], strides = [1, 1]} : vector<8x64xf32> to vector<1x32xf32>
    %228 = vector.extract_strided_slice %202 {offsets = [4, 0], sizes = [1, 32], strides = [1, 1]} : vector<16x32xf32> to vector<1x32xf32>
    %229 = arith.addf %227, %228 : vector<1x32xf32>
    %c0_201 = arith.constant 0 : index
    %c1_202 = arith.constant 1 : index
    %c0_203 = arith.constant 0 : index
    %230 = vector.load %arg24[%c0_201, %c1_202, %c0_203] : memref<1x4x128xf32, #tpu.memory_space<vmem>>, vector<1x1x32xf32>
    %231 = vector.shape_cast %230 : vector<1x1x32xf32> to vector<1x32xf32>
    %232 = vector.shape_cast %229 : vector<1x32xf32> to vector<1x1x32xf32>
    tpu.vector_store %arg24[%c0_201, %c1_202, %c0_203], %232 {strides = array<i32>} : memref<1x4x128xf32, #tpu.memory_space<vmem>>, vector<1x1x32xf32>,
    %233 = vector.extract_strided_slice %196 {offsets = [2, 32], sizes = [1, 32], strides = [1, 1]} : vector<8x64xf32> to vector<1x32xf32>
    %234 = vector.extract_strided_slice %202 {offsets = [5, 0], sizes = [1, 32], strides = [1, 1]} : vector<16x32xf32> to vector<1x32xf32>
    %235 = arith.addf %233, %234 : vector<1x32xf32>
    %c0_204 = arith.constant 0 : index
    %c1_205 = arith.constant 1 : index
    %c32_206 = arith.constant 32 : index
    %236 = vector.load %arg24[%c0_204, %c1_205, %c32_206] : memref<1x4x128xf32, #tpu.memory_space<vmem>>, vector<1x1x32xf32>
    %237 = vector.shape_cast %236 : vector<1x1x32xf32> to vector<1x32xf32>
    %238 = vector.shape_cast %235 : vector<1x32xf32> to vector<1x1x32xf32>
    tpu.vector_store %arg24[%c0_204, %c1_205, %c32_206], %238 {strides = array<i32>} : memref<1x4x128xf32, #tpu.memory_space<vmem>>, vector<1x1x32xf32>,
    %239 = vector.extract_strided_slice %196 {offsets = [3, 0], sizes = [1, 32], strides = [1, 1]} : vector<8x64xf32> to vector<1x32xf32>
    %240 = vector.extract_strided_slice %202 {offsets = [6, 0], sizes = [1, 32], strides = [1, 1]} : vector<16x32xf32> to vector<1x32xf32>
    %241 = arith.addf %239, %240 : vector<1x32xf32>
    %c0_207 = arith.constant 0 : index
    %c1_208 = arith.constant 1 : index
    %c64_209 = arith.constant 64 : index
    %242 = vector.load %arg24[%c0_207, %c1_208, %c64_209] : memref<1x4x128xf32, #tpu.memory_space<vmem>>, vector<1x1x32xf32>
    %243 = vector.shape_cast %242 : vector<1x1x32xf32> to vector<1x32xf32>
    %244 = vector.shape_cast %241 : vector<1x32xf32> to vector<1x1x32xf32>
    tpu.vector_store %arg24[%c0_207, %c1_208, %c64_209], %244 {strides = array<i32>} : memref<1x4x128xf32, #tpu.memory_space<vmem>>, vector<1x1x32xf32>,
    %245 = vector.extract_strided_slice %196 {offsets = [3, 32], sizes = [1, 32], strides = [1, 1]} : vector<8x64xf32> to vector<1x32xf32>
    %246 = vector.extract_strided_slice %202 {offsets = [7, 0], sizes = [1, 32], strides = [1, 1]} : vector<16x32xf32> to vector<1x32xf32>
    %247 = arith.addf %245, %246 : vector<1x32xf32>
    %c0_210 = arith.constant 0 : index
    %c1_211 = arith.constant 1 : index
    %c96_212 = arith.constant 96 : index
    %248 = vector.load %arg24[%c0_210, %c1_211, %c96_212] : memref<1x4x128xf32, #tpu.memory_space<vmem>>, vector<1x1x32xf32>
    %249 = vector.shape_cast %248 : vector<1x1x32xf32> to vector<1x32xf32>
    %250 = vector.shape_cast %247 : vector<1x32xf32> to vector<1x1x32xf32>
    tpu.vector_store %arg24[%c0_210, %c1_211, %c96_212], %250 {strides = array<i32>} : memref<1x4x128xf32, #tpu.memory_space<vmem>>, vector<1x1x32xf32>,
    %251 = vector.extract_strided_slice %196 {offsets = [4, 0], sizes = [1, 32], strides = [1, 1]} : vector<8x64xf32> to vector<1x32xf32>
    %252 = vector.extract_strided_slice %202 {offsets = [8, 0], sizes = [1, 32], strides = [1, 1]} : vector<16x32xf32> to vector<1x32xf32>
    %253 = arith.addf %251, %252 : vector<1x32xf32>
    %c0_213 = arith.constant 0 : index
    %c2_214 = arith.constant 2 : index
    %c0_215 = arith.constant 0 : index
    %254 = vector.load %arg24[%c0_213, %c2_214, %c0_215] : memref<1x4x128xf32, #tpu.memory_space<vmem>>, vector<1x1x32xf32>
    %255 = vector.shape_cast %254 : vector<1x1x32xf32> to vector<1x32xf32>
    %256 = vector.shape_cast %253 : vector<1x32xf32> to vector<1x1x32xf32>
    tpu.vector_store %arg24[%c0_213, %c2_214, %c0_215], %256 {strides = array<i32>} : memref<1x4x128xf32, #tpu.memory_space<vmem>>, vector<1x1x32xf32>,
    %257 = vector.extract_strided_slice %196 {offsets = [4, 32], sizes = [1, 32], strides = [1, 1]} : vector<8x64xf32> to vector<1x32xf32>
    %258 = vector.extract_strided_slice %202 {offsets = [9, 0], sizes = [1, 32], strides = [1, 1]} : vector<16x32xf32> to vector<1x32xf32>
    %259 = arith.addf %257, %258 : vector<1x32xf32>
    %c0_216 = arith.constant 0 : index
    %c2_217 = arith.constant 2 : index
    %c32_218 = arith.constant 32 : index
    %260 = vector.load %arg24[%c0_216, %c2_217, %c32_218] : memref<1x4x128xf32, #tpu.memory_space<vmem>>, vector<1x1x32xf32>
    %261 = vector.shape_cast %260 : vector<1x1x32xf32> to vector<1x32xf32>
    %262 = vector.shape_cast %259 : vector<1x32xf32> to vector<1x1x32xf32>
    tpu.vector_store %arg24[%c0_216, %c2_217, %c32_218], %262 {strides = array<i32>} : memref<1x4x128xf32, #tpu.memory_space<vmem>>, vector<1x1x32xf32>,
    %263 = vector.extract_strided_slice %196 {offsets = [5, 0], sizes = [1, 32], strides = [1, 1]} : vector<8x64xf32> to vector<1x32xf32>
    %264 = vector.extract_strided_slice %202 {offsets = [10, 0], sizes = [1, 32], strides = [1, 1]} : vector<16x32xf32> to vector<1x32xf32>
    %265 = arith.addf %263, %264 : vector<1x32xf32>
    %c0_219 = arith.constant 0 : index
    %c2_220 = arith.constant 2 : index
    %c64_221 = arith.constant 64 : index
    %266 = vector.load %arg24[%c0_219, %c2_220, %c64_221] : memref<1x4x128xf32, #tpu.memory_space<vmem>>, vector<1x1x32xf32>
    %267 = vector.shape_cast %266 : vector<1x1x32xf32> to vector<1x32xf32>
    %268 = vector.shape_cast %265 : vector<1x32xf32> to vector<1x1x32xf32>
    tpu.vector_store %arg24[%c0_219, %c2_220, %c64_221], %268 {strides = array<i32>} : memref<1x4x128xf32, #tpu.memory_space<vmem>>, vector<1x1x32xf32>,
    %269 = vector.extract_strided_slice %196 {offsets = [5, 32], sizes = [1, 32], strides = [1, 1]} : vector<8x64xf32> to vector<1x32xf32>
    %270 = vector.extract_strided_slice %202 {offsets = [11, 0], sizes = [1, 32], strides = [1, 1]} : vector<16x32xf32> to vector<1x32xf32>
    %271 = arith.addf %269, %270 : vector<1x32xf32>
    %c0_222 = arith.constant 0 : index
    %c2_223 = arith.constant 2 : index
    %c96_224 = arith.constant 96 : index
    %272 = vector.load %arg24[%c0_222, %c2_223, %c96_224] : memref<1x4x128xf32, #tpu.memory_space<vmem>>, vector<1x1x32xf32>
    %273 = vector.shape_cast %272 : vector<1x1x32xf32> to vector<1x32xf32>
    %274 = vector.shape_cast %271 : vector<1x32xf32> to vector<1x1x32xf32>
    tpu.vector_store %arg24[%c0_222, %c2_223, %c96_224], %274 {strides = array<i32>} : memref<1x4x128xf32, #tpu.memory_space<vmem>>, vector<1x1x32xf32>,
    %275 = vector.extract_strided_slice %196 {offsets = [6, 0], sizes = [1, 32], strides = [1, 1]} : vector<8x64xf32> to vector<1x32xf32>
    %276 = vector.extract_strided_slice %202 {offsets = [12, 0], sizes = [1, 32], strides = [1, 1]} : vector<16x32xf32> to vector<1x32xf32>
    %277 = arith.addf %275, %276 : vector<1x32xf32>
    %c0_225 = arith.constant 0 : index
    %c3_226 = arith.constant 3 : index
    %c0_227 = arith.constant 0 : index
    %278 = vector.load %arg24[%c0_225, %c3_226, %c0_227] : memref<1x4x128xf32, #tpu.memory_space<vmem>>, vector<1x1x32xf32>
    %279 = vector.shape_cast %278 : vector<1x1x32xf32> to vector<1x32xf32>
    %280 = vector.shape_cast %277 : vector<1x32xf32> to vector<1x1x32xf32>
    tpu.vector_store %arg24[%c0_225, %c3_226, %c0_227], %280 {strides = array<i32>} : memref<1x4x128xf32, #tpu.memory_space<vmem>>, vector<1x1x32xf32>,
    %281 = vector.extract_strided_slice %196 {offsets = [6, 32], sizes = [1, 32], strides = [1, 1]} : vector<8x64xf32> to vector<1x32xf32>
    %282 = vector.extract_strided_slice %202 {offsets = [13, 0], sizes = [1, 32], strides = [1, 1]} : vector<16x32xf32> to vector<1x32xf32>
    %283 = arith.addf %281, %282 : vector<1x32xf32>
    %c0_228 = arith.constant 0 : index
    %c3_229 = arith.constant 3 : index
    %c32_230 = arith.constant 32 : index
    %284 = vector.load %arg24[%c0_228, %c3_229, %c32_230] : memref<1x4x128xf32, #tpu.memory_space<vmem>>, vector<1x1x32xf32>
    %285 = vector.shape_cast %284 : vector<1x1x32xf32> to vector<1x32xf32>
    %286 = vector.shape_cast %283 : vector<1x32xf32> to vector<1x1x32xf32>
    tpu.vector_store %arg24[%c0_228, %c3_229, %c32_230], %286 {strides = array<i32>} : memref<1x4x128xf32, #tpu.memory_space<vmem>>, vector<1x1x32xf32>,
    %287 = vector.extract_strided_slice %196 {offsets = [7, 0], sizes = [1, 32], strides = [1, 1]} : vector<8x64xf32> to vector<1x32xf32>
    %288 = vector.extract_strided_slice %202 {offsets = [14, 0], sizes = [1, 32], strides = [1, 1]} : vector<16x32xf32> to vector<1x32xf32>
    %289 = arith.addf %287, %288 : vector<1x32xf32>
    %c0_231 = arith.constant 0 : index
    %c3_232 = arith.constant 3 : index
    %c64_233 = arith.constant 64 : index
    %290 = vector.load %arg24[%c0_231, %c3_232, %c64_233] : memref<1x4x128xf32, #tpu.memory_space<vmem>>, vector<1x1x32xf32>
    %291 = vector.shape_cast %290 : vector<1x1x32xf32> to vector<1x32xf32>
    %292 = vector.shape_cast %289 : vector<1x32xf32> to vector<1x1x32xf32>
    tpu.vector_store %arg24[%c0_231, %c3_232, %c64_233], %292 {strides = array<i32>} : memref<1x4x128xf32, #tpu.memory_space<vmem>>, vector<1x1x32xf32>,
    %293 = vector.extract_strided_slice %196 {offsets = [7, 32], sizes = [1, 32], strides = [1, 1]} : vector<8x64xf32> to vector<1x32xf32>
    %294 = vector.extract_strided_slice %202 {offsets = [15, 0], sizes = [1, 32], strides = [1, 1]} : vector<16x32xf32> to vector<1x32xf32>
    %295 = arith.addf %293, %294 : vector<1x32xf32>
    %c0_234 = arith.constant 0 : index
    %c3_235 = arith.constant 3 : index
    %c96_236 = arith.constant 96 : index
    %296 = vector.load %arg24[%c0_234, %c3_235, %c96_236] : memref<1x4x128xf32, #tpu.memory_space<vmem>>, vector<1x1x32xf32>
    %297 = vector.shape_cast %296 : vector<1x1x32xf32> to vector<1x32xf32>
    %298 = vector.shape_cast %295 : vector<1x32xf32> to vector<1x1x32xf32>
    tpu.vector_store %arg24[%c0_234, %c3_235, %c96_236], %298 {strides = array<i32>} : memref<1x4x128xf32, #tpu.memory_space<vmem>>, vector<1x1x32xf32>,
    return
  }
  func.func @transform_0(%arg0: i32) -> (i32, i32, i32) {
    %c0_i32 = arith.constant 0 : i32
    %c0_i32_0 = arith.constant 0 : i32
    %c0_i32_1 = arith.constant 0 : i32
    return %arg0, %c0_i32, %c0_i32_0 : i32, i32, i32
  }
  func.func @transform_1(%arg0: i32) -> (i32, i32, i32) {
    %c0_i32 = arith.constant 0 : i32
    %c0_i32_0 = arith.constant 0 : i32
    %c0_i32_1 = arith.constant 0 : i32
    %c0_i32_2 = arith.constant 0 : i32
    return %c0_i32, %c0_i32_0, %c0_i32_1 : i32, i32, i32
  }
  func.func @transform_2(%arg0: i32) -> (i32, i32) {
    %c0_i32 = arith.constant 0 : i32
    %c0_i32_0 = arith.constant 0 : i32
    %c0_i32_1 = arith.constant 0 : i32
    return %c0_i32, %c0_i32_0 : i32, i32
  }
  func.func @transform_3(%arg0: i32) -> (i32, i32, i32) {
    %c0_i32 = arith.constant 0 : i32
    %c0_i32_0 = arith.constant 0 : i32
    %c0_i32_1 = arith.constant 0 : i32
    %c0_i32_2 = arith.constant 0 : i32
    return %c0_i32, %c0_i32_0, %c0_i32_1 : i32, i32, i32
  }
  func.func @transform_4(%arg0: i32) -> (i32, i32) {
    %c0_i32 = arith.constant 0 : i32
    %c0_i32_0 = arith.constant 0 : i32
    %c0_i32_1 = arith.constant 0 : i32
    return %c0_i32, %c0_i32_0 : i32, i32
  }
  func.func @transform_5(%arg0: i32) -> (i32, i32) {
    %c0_i32 = arith.constant 0 : i32
    %c0_i32_0 = arith.constant 0 : i32
    %c0_i32_1 = arith.constant 0 : i32
    return %c0_i32, %c0_i32_0 : i32, i32
  }
  func.func @transform_6(%arg0: i32) -> (i32, i32) {
    %c0_i32 = arith.constant 0 : i32
    %c0_i32_0 = arith.constant 0 : i32
    %c0_i32_1 = arith.constant 0 : i32
    return %c0_i32, %c0_i32_0 : i32, i32
  }
  func.func @transform_7(%arg0: i32) -> (i32, i32, i32) {
    %c0_i32 = arith.constant 0 : i32
    %c0_i32_0 = arith.constant 0 : i32
    %c0_i32_1 = arith.constant 0 : i32
    %c0_i32_2 = arith.constant 0 : i32
    return %c0_i32, %c0_i32_0, %c0_i32_1 : i32, i32, i32
  }
  func.func @transform_8(%arg0: i32) -> (i32, i32) {
    %c0_i32 = arith.constant 0 : i32
    %c0_i32_0 = arith.constant 0 : i32
    %c0_i32_1 = arith.constant 0 : i32
    return %c0_i32, %c0_i32_0 : i32, i32
  }
  func.func @transform_9(%arg0: i32) -> (i32, i32, i32) {
    %c0_i32 = arith.constant 0 : i32
    %c0_i32_0 = arith.constant 0 : i32
    %c0_i32_1 = arith.constant 0 : i32
    %c0_i32_2 = arith.constant 0 : i32
    return %c0_i32, %c0_i32_0, %c0_i32_1 : i32, i32, i32
  }
  func.func @transform_10(%arg0: i32) -> (i32, i32) {
    %c0_i32 = arith.constant 0 : i32
    %c0_i32_0 = arith.constant 0 : i32
    %c0_i32_1 = arith.constant 0 : i32
    return %c0_i32, %c0_i32_0 : i32, i32
  }
  func.func @transform_11(%arg0: i32) -> (i32, i32) {
    %c0_i32 = arith.constant 0 : i32
    %c0_i32_0 = arith.constant 0 : i32
    %c0_i32_1 = arith.constant 0 : i32
    return %c0_i32, %c0_i32_0 : i32, i32
  }
  func.func @transform_12(%arg0: i32) -> (i32, i32) {
    %c0_i32 = arith.constant 0 : i32
    %c0_i32_0 = arith.constant 0 : i32
    %c0_i32_1 = arith.constant 0 : i32
    return %c0_i32, %c0_i32_0 : i32, i32
  }
  func.func @transform_13(%arg0: i32) -> (i32, i32) {
    %c0_i32 = arith.constant 0 : i32
    %c0_i32_0 = arith.constant 0 : i32
    %c0_i32_1 = arith.constant 0 : i32
    return %c0_i32, %c0_i32_0 : i32, i32
  }
  func.func @transform_14(%arg0: i32) -> (i32, i32) {
    %c0_i32 = arith.constant 0 : i32
    %c0_i32_0 = arith.constant 0 : i32
    %c0_i32_1 = arith.constant 0 : i32
    return %c0_i32, %c0_i32_0 : i32, i32
  }
  func.func @transform_15(%arg0: i32) -> (i32, i32, i32) {
    %c0_i32 = arith.constant 0 : i32
    %c0_i32_0 = arith.constant 0 : i32
    %c0_i32_1 = arith.constant 0 : i32
    %c0_i32_2 = arith.constant 0 : i32
    return %c0_i32, %c0_i32_0, %c0_i32_1 : i32, i32, i32
  }
  func.func @transform_16(%arg0: i32) -> (i32, i32) {
    %c0_i32 = arith.constant 0 : i32
    %c0_i32_0 = arith.constant 0 : i32
    %c0_i32_1 = arith.constant 0 : i32
    return %c0_i32, %c0_i32_0 : i32, i32
  }
  func.func @transform_17(%arg0: i32) -> (i32, i32) {
    %c0_i32 = arith.constant 0 : i32
    %c0_i32_0 = arith.constant 0 : i32
    %c0_i32_1 = arith.constant 0 : i32
    return %c0_i32, %c0_i32_0 : i32, i32
  }
  func.func @transform_18(%arg0: i32) -> (i32, i32) {
    %c0_i32 = arith.constant 0 : i32
    %c0_i32_0 = arith.constant 0 : i32
    %c0_i32_1 = arith.constant 0 : i32
    return %c0_i32, %c0_i32_0 : i32, i32
  }
  func.func @transform_19(%arg0: i32) -> (i32, i32, i32) {
    %c0_i32 = arith.constant 0 : i32
    %c0_i32_0 = arith.constant 0 : i32
    %c0_i32_1 = arith.constant 0 : i32
    %c0_i32_2 = arith.constant 0 : i32
    return %c0_i32, %c0_i32_0, %c0_i32_1 : i32, i32, i32
  }
  func.func @transform_20(%arg0: i32) -> (i32, i32) {
    %c0_i32 = arith.constant 0 : i32
    %c0_i32_0 = arith.constant 0 : i32
    %c0_i32_1 = arith.constant 0 : i32
    return %c0_i32, %c0_i32_0 : i32, i32
  }
  func.func @transform_21(%arg0: i32) -> (i32, i32) {
    %c0_i32 = arith.constant 0 : i32
    %c0_i32_0 = arith.constant 0 : i32
    %c0_i32_1 = arith.constant 0 : i32
    return %c0_i32, %c0_i32_0 : i32, i32
  }
  func.func @transform_22(%arg0: i32) -> (i32, i32) {
    %c0_i32 = arith.constant 0 : i32
    %c0_i32_0 = arith.constant 0 : i32
    %c0_i32_1 = arith.constant 0 : i32
    return %c0_i32, %c0_i32_0 : i32, i32
  }
  func.func @transform_23(%arg0: i32) -> (i32, i32, i32) {
    %c0_i32 = arith.constant 0 : i32
    %c0_i32_0 = arith.constant 0 : i32
    %c0_i32_1 = arith.constant 0 : i32
    return %arg0, %c0_i32, %c0_i32_0 : i32, i32, i32
  }
}

</mosaic_0001>

<bundles_post_ra>
// kernel: fpn_block_forward.1
= control target key start
LH: loop header
LB: loop body
LE: loop exit
PB: predicated region body
PF: predicated region fallthrough
CT: control target
= control target key end

     0   :  { %s4967_s0 = inlined_call_operand.vmem [shape: f32[2,16,128], index: 0, kind: input, shape index: {}]   ;;  %s4968_s1 = inlined_call_operand.vmem [shape: bf16[3,128,128], index: 1, kind: input, shape index: {}]   ;;  %s4969_s2 = inlined_call_operand.vmem [shape: f32[1,128], index: 2, kind: input, shape index: {}]   ;;  %s4970_s3 = inlined_call_operand.vmem [shape: bf16[3,128,128], index: 3, kind: input, shape index: {}]   ;;  %s4971_s4 = inlined_call_operand.vmem [shape: f32[1,128], index: 4, kind: input, shape index: {}]   ;;  %s4972_s5 = inlined_call_operand.vmem [shape: f32[8,16], index: 5, kind: input, shape index: {}]   ;;  %s4973_s6 = inlined_call_operand.vmem [shape: f32[128,64], index: 6, kind: input, shape index: {}]   ;;  %s4974_s7 = inlined_call_operand.vmem [shape: bf16[3,64,64], index: 7, kind: input, shape index: {}]   ;;  %s4975_s8 = inlined_call_operand.vmem [shape: f32[1,64], index: 8, kind: input, shape index: {}]   ;;  %s4976_s9 = inlined_call_operand.vmem [shape: bf16[3,64,64], index: 9, kind: input, shape index: {}]   ;;  %s4977_s10 = inlined_call_operand.vmem [shape: f32[1,64], index: 10, kind: input, shape index: {}]   ;;  %s4978_s11 = inlined_call_operand.vmem [shape: f32[4,8], index: 11, kind: input, shape index: {}]   ;;  %s4979_s12 = inlined_call_operand.vmem [shape: f32[64,32], index: 12, kind: input, shape index: {}]   ;;  %s4980_s13 = inlined_call_operand.vmem [shape: bf16[32,8], index: 13, kind: input, shape index: {}]   ;;  %s4981_s14 = inlined_call_operand.vmem [shape: f32[1,8], index: 14, kind: input, shape index: {}]   ;;  %s4982_s15 = inlined_call_operand.vmem [shape: bf16[3,8,32], index: 15, kind: input, shape index: {}]   ;;  %s4983_s16 = inlined_call_operand.vmem [shape: f32[1,32], index: 16, kind: input, shape index: {}]   ;;  %s4984_s17 = inlined_call_operand.vmem [shape: bf16[64,16], index: 17, kind: input, shape index: {}]   ;;  %s4985_s18 = inlined_call_operand.vmem [shape: f32[1,16], index: 18, kind: input, shape index: {}]   ;;  %s4986_s19 = inlined_call_operand.vmem [shape: bf16[3,16,64], index: 19, kind: input, shape index: {}]   ;;  %s4987_s20 = inlined_call_operand.vmem [shape: f32[1,64], index: 20, kind: input, shape index: {}]   ;;  %s4988_s21 = inlined_call_operand.vmem [shape: bf16[128,32], index: 21, kind: input, shape index: {}]   ;;  %s4989_s22 = inlined_call_operand.vmem [shape: f32[1,32], index: 22, kind: input, shape index: {}]   ;;  %s4990_s23 = inlined_call_operand.vmem [shape: f32[2,4,128], index: 23, kind: output, shape index: {}]  }
   0x1   :  { %4995 = sst [smem:[#allocation6_spill]] %s4967_s0 }
   0x2   :  { %4996 = sst [smem:[#allocation7_spill]] %s4968_s1 }
   0x3   :  { %4997 = sst [smem:[#allocation8_spill]] %s4969_s2 }
   0x4   :  { %4998 = sst [smem:[#allocation9_spill]] %s4970_s3 }
   0x5   :  { %4999 = sst [smem:[#allocation10_spill]] %s4971_s4  ;;  %s4249_s4 = smov 0  }
   0x6   :  { %5000 = sst [smem:[#allocation11_spill]] %s4972_s5 }
   0x7   :  { %5001 = sst [smem:[#allocation12_spill]] %s4973_s6 }
   0x8   :  { %5002 = sst [smem:[#allocation13_spill]] %s4974_s7 }
   0x9 LB: > { %s3233_s30 = sadd.s32 4294967295, %s4120_s4   ;;  %p3237_p0 = scmp.ge.s32.totalorder %s4120_s4, 1  ;;  %s4120_s4 = sphi %s4249_s4, %s33_s4  }
   0xa   : > { %p637_p1 = scmp.lt.s32.totalorder %s4120_s4, 3 }
   0xc   : > { %p638_p2 = pnand %p3237_p0, %p637_p1 }
   0xd   : > { %s5003_s5 = sld [smem:[#allocation7_spill]] (!%p638_p2)  ;;  %v4122_v1 = vmov (!%p638_p2), 0.0   ;;  %vm4123_vm0 = vmmov (!%p638_p2), 0   ;;  %p700_p3 = scmp.lt.s32.totalorder (!%p638_p2), %s3233_s30, 1  ;;  %vm712_vm1 = vcmask (!%p638_p2), 1040384   ;;  %vm751_vm7 = vcmask (!%p638_p2), 1043456  }
   0xe   : > { %641 = sbr.rel (%p638_p2) target bundleno = 3176 (0xc68), region = 112  ;;  %3627 = vmatprep.subr.bf16.mxu0 (!%p638_p2), %v4122_v1  ;;  %3647 = vmatprep.subr.bf16.mxu1 (!%p638_p2), %v4122_v1  ;;  %s5004_s7 = sld [smem:[#allocation6_spill]] (!%p638_p2)  ;;  %vm713_vm2 = vsmask.f32 (!%p638_p2), 256  ;;  %v715_v13 = vld [vmem:[#allocation2] sm:$0x1] (!%p638_p2) }
   0xf   : > { %3643 = vmatprep.mubr.msk.bf16.mxu0 (!%p638_p2), %vm4123_vm0, %v4122_v1  ;;  %3663 = vmatprep.mubr.msk.bf16.mxu1 (!%p638_p2), %vm4123_vm0, %v4122_v1  ;;  %vm4316_vm3 = vmand (!%p638_p2), %vm712_vm1, %vm713_vm2  ;;  %vm718_vm4 = vsmask.f32 (!%p638_p2), 7938  ;;  %v720_v16 = vld [vmem:[#allocation2 + $0x8] sm:$0x1] (!%p638_p2)  ;;  %vm729_vm6 = vsmask.f32 (!%p638_p2), 4368 }
  0x10   : > { %v716_v20 = vsel (!%p638_p2), %vm4316_vm3, 0, %v715_v13  ;;  %vm719_vm5 = vmand (!%p638_p2), %vm712_vm1, %vm718_vm4  ;;  %vm804_vm10 = vsmask.f32 (!%p638_p2), 7424  ;;  %vm1018_vm11 = vcmask (!%p638_p2), 1046528   ;;  %s5012_s27 = sld [smem:[#allocation8_spill]] (!%p638_p2)  ;;  %s5013_s26 = sld [smem:[#allocation12_spill]] (!%p638_p2) }
  0x11   : > { %717 = vst [vmem:[#allocation2] sm:$0x1] (!%p638_p2), %v716_v20  ;;  %v721_v21 = vsel (!%p638_p2), %vm719_vm5, 0, %v720_v16  ;;  %vm4337_vm8 = vmor (!%p638_p2), %vm713_vm2, %vm729_vm6  ;;  %s5015_s3 = sld [smem:[#allocation11_spill]] (!%p638_p2)  ;;  %vm1523_vm12 = vcmask (!%p638_p2), 130048   ;;  %vm1683_vm13 = vcmask (!%p638_p2), 516096  }
  0x12   : > { %722 = vst [vmem:[#allocation2 + $0x8] sm:$0x1] (!%p638_p2), %v721_v21  ;;  %vm4347_vm9 = vmand (!%p638_p2), %vm751_vm7, %vm718_vm4  ;;  %s5018_s25 = sld [smem:[#allocation13_spill]] (!%p638_p2)  ;;  %vm1706_vm1 = vcmask (!%p638_p2), 519168   ;;  %vm2427_vm5 = vcmask (!%p638_p2), 261120   ;;  %vm2471_vm6 = vcmask (!%p638_p2), 57344  }
  0x13   : > { %v4015_v0 = vld [vmem:[%s5003_s5 + $0x40] sm:$0xff] (!%p638_p2)   ;;  %v4017_v3 = vld [vmem:[%s5003_s5 + $0x48] sm:$0xff] (!%p638_p2)   ;;  %v4019_v5 = vld [vmem:[%s5003_s5 + $0x50] sm:$0xff] (!%p638_p2)   ;;  %2472 = vst.msk [vmem:[#allocation4] sm:$0x1] (!%p638_p2), %vm2471_vm6, %v4122_v1  ;;  %s4125_s6 = smov (!%p638_p2), 16  }
  0x14   : > { %v4016_v2 = vld [vmem:[%s5003_s5] sm:$0xff] (!%p638_p2)   ;;  %3628 = vmatpush3.bf16.msra.mxu0 (!%p638_p2), %v4015_v0  ;;  %v4018_v4 = vld [vmem:[%s5003_s5 + $0x8] sm:$0xff] (!%p638_p2)   ;;  %v4020_v6 = vld [vmem:[%s5003_s5 + $0x10] sm:$0xff] (!%p638_p2)   ;;  %2473 = vst.msk [vmem:[#allocation4 + $0x5] sm:$0x1] (!%p638_p2), %vm2471_vm6, %v4122_v1  ;;  %s4126_s0 = smov (!%p638_p2), 112  }
  0x15   : > { %3648 = vmatpush3.bf16.msra.mxu1 %v4016_v2  ;;  %3629 = vmatprep.subr.bf16.mxu0 %v4122_v1  ;;  %s5022_s30 = smov (!%p700_p3, %s3233_s30), 1  ;;  %v4021_v7 = vld [vmem:[%s5003_s5 + $0x58] sm:$0xff]   ;;  %v4023_v9 = vld [vmem:[%s5003_s5 + $0x60] sm:$0xff]   ;;  %v4025_v14 = vld [vmem:[%s5003_s5 + $0x68] sm:$0xff]   ;;  %vm3168_vm6 = vcmask 785927  }
  0x16   : > { %3649 = vmatprep.subr.bf16.mxu1 %v4122_v1  ;;  %s3476_s1 = sshll.u32 %s5022_s30, 4  ;;  %v4022_v8 = vld [vmem:[%s5003_s5 + $0x18] sm:$0xff]   ;;  %v4024_v10 = vld [vmem:[%s5003_s5 + $0x20] sm:$0xff]   ;;  %v4026_v19 = vld [vmem:[%s5003_s5 + $0x28] sm:$0xff]  }
  0x17   : > { %s704_s28 = scalar_lea.vmem %s5004_s7, %s3476_s1  ;;  %v4027_v26 = vld [vmem:[%s5003_s5 + $0x70] sm:$0xff]   ;;  %v4029_v37 = vld [vmem:[%s5003_s5 + $0x78] sm:$0xff]   ;;  %v4033_v56 = vld [vmem:[%s5003_s5 + $0x80] sm:$0xff]   ;;  %s5011_s7 = sld [smem:[#allocation9_spill]] }
  0x18   : > { %3630 = vmatpush3.bf16.msra.mxu0 %v4017_v3  ;;  %v4307_v11 = vld [vmem:[%s704_s28] sm:$0xff]  ;;  %v4309_v12 = vld [vmem:[%s704_s28 + $0x8] sm:$0xff]  ;;  %v4028_v30 = vld [vmem:[%s5003_s5 + $0x30] sm:$0xff]  }
  0x19   : > { %3650 = vmatpush3.bf16.msra.mxu1 %v4018_v4  ;;  %3631 = vmatprep.subr.bf16.mxu0 %v4122_v1  ;;  %v3477_v17 = vpack.c.bf16 %v4307_v11, %v4307_v11  ;;  %v3478_v18 = vpack.c.bf16 %v4309_v12, %v4309_v12  ;;  %v753_v38 = vld [vmem:[#allocation2] sm:$0xf]  ;;  %v4030_v39 = vld [vmem:[%s5003_s5 + $0x38] sm:$0xff]   ;;  %v757_v41 = vld [vmem:[#allocation2 + $0x8] sm:$0x1] }
  0x1a   : > { %3651 = vmatprep.subr.bf16.mxu1 %v4122_v1  ;;  %v4034_v59 = vld [vmem:[%s5003_s5 + $0x88] sm:$0xff]   ;;  %v4035_v60 = vld [vmem:[%s5003_s5 + $0x90] sm:$0xff]   ;;  %v4036_v61 = vld [vmem:[%s5003_s5 + $0x98] sm:$0xff]  }
  0x1b   : > { %v732_v22 = vshrl.u32 %v3477_v17, 16  ;;  %v735_v23 = vshll.u32 %v3477_v17, 16  ;;  %v740_v24 = vshrl.u32 %v3478_v18, 16  ;;  %v743_v25 = vshll.u32 %v3478_v18, 16  ;;  %v4037_v62 = vld [vmem:[%s5003_s5 + $0xa0] sm:$0xff]   ;;  %v4038_v63 = vld [vmem:[%s5003_s5 + $0xa8] sm:$0xff]   ;;  %vm4599_vm14 = vmand %vm1683_vm13, %vm713_vm2 }
  0x1c   : > { %3632 = vmatpush3.bf16.msra.mxu0 %v4019_v5  ;;  %v4039_v0 = vld [vmem:[%s5003_s5 + $0xb0] sm:$0xff]   ;;  %v4040_v2 = vld [vmem:[%s5003_s5 + $0xb8] sm:$0xff]   ;;  %vm1688_vm15 = vmand %vm1683_vm13, %vm718_vm4  ;;  %vm3153_vm13 = vcmask 260102  }
  0x1d   : > { %3652 = vmatpush3.bf16.msra.mxu1 %v4020_v6  ;;  %3633 = vmatprep.subr.bf16.mxu0 %v4122_v1  ;;  %v734_v28 = vrot.slane %v732_v22, 7  ;;  %v742_v29 = vrot.slane %v740_v24, 7  ;;  %v4042_v4 = vld [vmem:[%s5011_s7] sm:$0xff]   ;;  %v4043_v5 = vld [vmem:[%s5011_s7 + $0x8] sm:$0xff]   ;;  %v4053_v18 = vld [vmem:[%s5011_s7 + $0x30] sm:$0xff]  }
  0x1e   : > { %3653 = vmatprep.subr.bf16.mxu1 %v4122_v1  ;;  %v4044_v6 = vld [vmem:[%s5011_s7 + $0x40] sm:$0xff]   ;;  %v4051_v16 = vld [vmem:[%s5011_s7 + $0x28] sm:$0xff]   ;;  %v4055_v20 = vld [vmem:[%s5011_s7 + $0x38] sm:$0xff]  }
  0x1f   : > { %v737_v31 = vor.u32 %v735_v23, %v734_v28  ;;  %v738_v32 = vrot.slane %v734_v28, 4  ;;  %v745_v33 = vor.u32 %v743_v25, %v742_v29  ;;  %v747_v34 = vrot.slane %v742_v29, 4  ;;  %v4049_v13 = vld [vmem:[%s5011_s7 + $0x20] sm:$0xff]   ;;  %v4056_v21 = vld [vmem:[%s5011_s7 + $0x70] sm:$0xff]   ;;  %v4058_v22 = vld [vmem:[%s5011_s7 + $0x78] sm:$0xff]  }
  0x20   : > { %3634 = vmatpush3.bf16.msra.mxu0 %v4021_v7  ;;  %v4045_v7 = vld [vmem:[%s5011_s7 + $0x10] sm:$0xff]   ;;  %v4052_v17 = vld [vmem:[%s5011_s7 + $0x60] sm:$0xff]   ;;  %vm4627_vm2 = vmand %vm1706_vm1, %vm718_vm4  ;;  %vm2248_vm4 = vcmask 64512   ;;  %vm3068_vm1 = vcmask 516352  }
  0x21   : > { %3654 = vmatpush3.bf16.msra.mxu1 %v4022_v8  ;;  %3635 = vmatprep.subr.bf16.mxu0 %v4122_v1  ;;  %v746_v36 = vsel %vm4337_vm8, %v738_v32, %v745_v33  ;;  %v754_v40 = vsel %vm4347_vm9, %v737_v31, %v753_v38  ;;  %v758_v42 = vsel %vm4316_vm3, %v747_v34, %v757_v41  ;;  %v4046_v8 = vld [vmem:[%s5011_s7 + $0x48] sm:$0xff]   ;;  %v4060_v15 = vld [vmem:[%s5011_s7 + $0x80] sm:$0xff]  }
  0x22   : > { %3655 = vmatprep.subr.bf16.mxu1 %v4122_v1  ;;  %756 = vst [vmem:[#allocation2 + $0x4] sm:$0xf] %v746_v36  ;;  %755 = vst [vmem:[#allocation2] sm:$0xf] %v754_v40  ;;  %v3302_v36 = vld [vmem:[%s5012_s27] ss:$0 sm:$0xff] }
  0x23   : > { %759 = vst [vmem:[#allocation2 + $0x8] sm:$0x1] %v758_v42  ;;  %s5014_s27 = sld [smem:[#allocation10_spill]] }
  0x24   : > { %3636 = vmatpush3.bf16.msra.mxu0 %v4023_v9  ;;  %v4047_v9 = vld [vmem:[%s5011_s7 + $0x18] sm:$0xff]  }
  0x25   : > { %3656 = vmatpush3.bf16.msra.mxu1 %v4024_v10  ;;  %3637 = vmatprep.subr.bf16.mxu0 %v4122_v1  ;;  %v4048_v10 = vld [vmem:[%s5011_s7 + $0x50] sm:$0xff]  }
  0x26   : > { %3657 = vmatprep.subr.bf16.mxu1 %v4122_v1 }
  0x28   : > { %3638 = vmatpush3.bf16.msra.mxu0 %v4025_v14  ;;  %v4050_v14 = vld [vmem:[%s5011_s7 + $0x58] sm:$0xff]  }
  0x29   : > { %3658 = vmatpush3.bf16.msra.mxu1 %v4026_v19  ;;  %3639 = vmatprep.subr.bf16.mxu0 %v4122_v1  ;;  %v761_v43 = vld [vmem:[#allocation2 + $0x4] sm:$0xf]  ;;  %v4368_v44 = vld [vmem:[#allocation2] sm:$0xf]  ;;  %v4054_v19 = vld [vmem:[%s5011_s7 + $0x68] sm:$0xff]  }
  0x2a   : > { %3659 = vmatprep.subr.bf16.mxu1 %v4122_v1  ;;  %v997_v45 = vld [vmem:[#allocation2] sm:$0xe]  ;;  %v3259_v46 = vcombine.low %v4368_v44, %v761_v43  ;;  %v4032_v47 = vld [vmem:[#allocation2 + $0x8] ss:$0 sps:$4 sm:$0x11]  }
  0x2b   : > { %v3293_v48 = vcombine.low %v997_v45, %v761_v43  ;;  %v813_v51 = vshll.u32 %v4032_v47, 16  ;;  %v1020_v53 = vrot.slane %v4032_v47, 1 }
  0x2c   : > { %3640 = vmatpush3.bf16.msra.mxu0 %v4027_v26  ;;  %v806_v49 = vshrl.u32 %v3259_v46, 16  ;;  %v808_v50 = vshll.u32 %v3259_v46, 16 }
  0x2d   : > { %3660 = vmatpush3.bf16.msra.mxu1 %v4028_v30  ;;  %3641 = vmatprep.subr.bf16.mxu0 %v4122_v1  ;;  %v1019_v52 = vrot.slane %v3293_v48, 1  ;;  %v815_v55 = vrot.slane %v813_v51, 1 }
  0x2e   : > { %3661 = vmatprep.subr.bf16.mxu1 %v4122_v1  ;;  %v810_v54 = vrot.slane %v808_v50, 1 }
  0x2f   : > { %v1021_v3 = vsel %vm1018_vm11, %v1019_v52, %v1020_v53 }
  0x30   : > { %3642 = vmatpush3.bf16.msra.mxu0 %v4029_v37  ;;  %v811_v57 = vor.u32 %v810_v54, %v806_v49 }
  0x31   : > { %3662 = vmatpush3.bf16.msra.mxu1 %v4030_v39  ;;  %3667 = vmatprep.subr.bf16.mxu0 %v4122_v1 }
  0x32   : > { %3687 = vmatprep.subr.bf16.mxu1 %v4122_v1  ;;  %v816_v58 = vsel %vm804_vm10, %v811_v57, %v815_v55 }
  0x33   : > { %3644 = vmatmul.mubr.bf16.vlgmr.msra.gmra.mrb[0].mxu0 %v816_v58 }
  0x34   : > { %3664 = vmatmul.mubr.bf16.vlgmr.msra.gmra.mrb[0].mxu1 %v3259_v46  ;;  %3668 = vmatpush3.bf16.msra.mxu0 %v4033_v56  ;;  %v1154_v56 = vld [vmem:[#allocation2 + $0x8] sm:$0x1] }
  0x35   : > { %3703 = vmatprep.mubr.msk.bf16.mxu1 %vm4123_vm0, %v4122_v1  ;;  %3683 = vmatprep.mubr.msk.bf16.mxu0 %vm4123_vm0, %v4122_v1 }
  0x36   : > { %3669 = vmatprep.subr.bf16.mxu0 %v4122_v1  ;;  %3688 = vmatpush3.bf16.msra.mxu1 %v4044_v6 }
  0x37   : > { %3689 = vmatprep.subr.bf16.mxu1 %v4122_v1 }
  0x38   : > { %3670 = vmatpush3.bf16.msra.mxu0 %v4034_v59 }
  0x39   : > { %3671 = vmatprep.subr.bf16.mxu0 %v4122_v1 }
  0x3a   : > { %3690 = vmatpush3.bf16.msra.mxu1 %v4046_v8  ;;  %v4061_v8 = vld [vmem:[%s5011_s7 + $0x88] sm:$0xff]  }
  0x3b   : > { %3691 = vmatprep.subr.bf16.mxu1 %v4122_v1 }
  0x3c   : > { %3672 = vmatpush3.bf16.msra.mxu0 %v4035_v60 }
  0x3d   : > { %3673 = vmatprep.subr.bf16.mxu0 %v4122_v1 }
  0x3e   : > { %3692 = vmatpush3.bf16.msra.mxu1 %v4048_v10  ;;  %v4063_v10 = vld [vmem:[%s5011_s7 + $0x98] sm:$0xff]  }
  0x3f   : > { %3693 = vmatprep.subr.bf16.mxu1 %v4122_v1 }
  0x40   : > { %3674 = vmatpush3.bf16.msra.mxu0 %v4036_v61 }
  0x41   : > { %3675 = vmatprep.subr.bf16.mxu0 %v4122_v1 }
  0x42   : > { %3694 = vmatpush3.bf16.msra.mxu1 %v4050_v14  ;;  %v4065_v14 = vld [vmem:[%s5011_s7 + $0xa8] sm:$0xff]  }
  0x43   : > { %3695 = vmatprep.subr.bf16.mxu1 %v4122_v1 }
  0x44   : > { %3676 = vmatpush3.bf16.msra.mxu0 %v4037_v62 }
  0x45   : > { %3677 = vmatprep.subr.bf16.mxu0 %v4122_v1 }
  0x46   : > { %3696 = vmatpush3.bf16.msra.mxu1 %v4052_v17 }
  0x47   : > { %3697 = vmatprep.subr.bf16.mxu1 %v4122_v1 }
  0x48   : > { %3678 = vmatpush3.bf16.msra.mxu0 %v4038_v63 }
  0x49   : > { %3679 = vmatprep.subr.bf16.mxu0 %v4122_v1 }
  0x4a   : > { %3698 = vmatpush3.bf16.msra.mxu1 %v4054_v19  ;;  %v4067_v19 = vld [vmem:[%s5011_s7 + $0xb8] sm:$0xff]  }
  0x4b   : > { %3699 = vmatprep.subr.bf16.mxu1 %v4122_v1 }
  0x4c   : > { %3680 = vmatpush3.bf16.msra.mxu0 %v4039_v0 }
  0x4d   : > { %3681 = vmatprep.subr.bf16.mxu0 %v4122_v1 }
  0x4e   : > { %3700 = vmatpush3.bf16.msra.mxu1 %v4056_v21 }
  0x4f   : > { %3701 = vmatprep.subr.bf16.mxu1 %v4122_v1 }
  0x50   : > { %3682 = vmatpush3.bf16.msra.mxu0 %v4040_v2 }
  0x51   : > { %3707 = vmatprep.subr.bf16.mxu0 %v4122_v1 }
  0x52   : > { %3702 = vmatpush3.bf16.msra.mxu1 %v4058_v22 }
  0x53   : > { %3684 = vmatmul.mubr.bf16.vlgmr.msra.gmra.mrb[4].mxu0 %v1021_v3  ;;  %3727 = vmatprep.subr.bf16.mxu1 %v4122_v1 }
  0x54   : > { %3723 = vmatprep.mubr.msk.bf16.mxu0 %vm4123_vm0, %v4122_v1  ;;  %3708 = vmatpush3.bf16.msra.mxu0 %v4042_v4 }
  0x55   : > { %3709 = vmatprep.subr.bf16.mxu0 %v4122_v1 }
  0x58   : > { %3710 = vmatpush3.bf16.msra.mxu0 %v4043_v5 }
  0x59   : > { %3711 = vmatprep.subr.bf16.mxu0 %v4122_v1 }
  0x5c   : > { %3712 = vmatpush3.bf16.msra.mxu0 %v4045_v7 }
  0x5d   : > { %3713 = vmatprep.subr.bf16.mxu0 %v4122_v1 }
  0x60   : > { %3714 = vmatpush3.bf16.msra.mxu0 %v4047_v9  ;;  %v4062_v9 = vld [vmem:[%s5011_s7 + $0x90] sm:$0xff]  }
  0x61   : > { %3715 = vmatprep.subr.bf16.mxu0 %v4122_v1 }
  0x64   : > { %3716 = vmatpush3.bf16.msra.mxu0 %v4049_v13  ;;  %v4064_v13 = vld [vmem:[%s5011_s7 + $0xa0] sm:$0xff]  }
  0x65   : > { %3717 = vmatprep.subr.bf16.mxu0 %v4122_v1 }
  0x68   : > { %3718 = vmatpush3.bf16.msra.mxu0 %v4051_v16  ;;  %v4066_v16 = vld [vmem:[%s5011_s7 + $0xb0] sm:$0xff]  }
  0x69   : > { %3719 = vmatprep.subr.bf16.mxu0 %v4122_v1 }
  0x6c   : > { %3720 = vmatpush3.bf16.msra.mxu0 %v4053_v18 }
  0x6d   : > { %3721 = vmatprep.subr.bf16.mxu0 %v4122_v1 }
  0x70   : > { %3722 = vmatpush3.bf16.msra.mxu0 %v4055_v20 }
 0x106   : > { %v900_v28 = vpop.f32.mrb[0].mxu0 }
 0x107   : > { %v990_v23 = vpop.f32.mrb[0].mxu1  ;;  %v3645_v30 = vpop.f32.mrb[1].mxu0 }
 0x108   : > { %v3665_v24 = vpop.f32.mrb[1].mxu1  ;;  %v991_v29 = vadd.f32 %v990_v23, %v900_v28  ;;  %v903_v31 = vpop.f32.mrb[2].mxu0  ;;  %v4124_v23 = vmov 0.0|0.0  }
 0x109   : > { %v993_v25 = vpop.f32.mrb[2].mxu1  ;;  %v3646_v33 = vpop.f32.mrb[3].mxu0  ;;  %3961 = vmatprep.subr.bf16.mxu0 %v4124_v23  ;;  %v1597_v24 = vld [vmem:[%s5013_s26] sm:$0xff] }
 0x10a   : > { %v3666_v26 = vpop.f32.mrb[3].mxu1  ;;  %v994_v32 = vadd.f32 %v993_v25, %v903_v31  ;;  %v1598_v25 = vld [vmem:[%s5013_s26 + $0x8] sm:$0xff]  ;;  %v1601_v31 = vld [vmem:[%s5013_s26 + $0x20] sm:$0xff] }
 0x10b   : > { %v1599_v26 = vld [vmem:[%s5013_s26 + $0x10] sm:$0xff]  ;;  %v3965_v28 = vpack.c.bf16 %v1598_v25, %v1597_v24 }
 0x126   : > { %v1105_v34 = vpop.f32.mrb[4].mxu0 }
 0x127   : > { %v1112_v37 = vadd.f32 %v1105_v34, %v991_v29  ;;  %v3685_v38 = vpop.f32.mrb[5].mxu0  ;;  %v1600_v29 = vld [vmem:[%s5013_s26 + $0x18] sm:$0xff]  ;;  %v1603_v34 = vld [vmem:[%s5013_s26 + $0x30] sm:$0xff] }
 0x128   : > { %v1108_v39 = vpop.f32.mrb[6].mxu0  ;;  %v3968_v30 = vpack.c.bf16 %v1600_v29, %v1599_v26  ;;  %v1605_v38 = vld [vmem:[%s5013_s26 + $0x40] sm:$0xff] }
 0x129   : > { %v1121_v40 = vadd.f32 %v3302_v36, %v1112_v37  ;;  %v1113_v41 = vadd.f32 %v1108_v39, %v994_v32  ;;  %v3686_v42 = vpop.f32.mrb[7].mxu0  ;;  %v1602_v32 = vld [vmem:[%s5013_s26 + $0x28] sm:$0xff]  ;;  %v4093_v29 = vld [vmem:[%s4976_s9 + $0x40] sm:$0xff]  }
 0x12a   : > { %v3971_v33 = vpack.c.bf16 %v1602_v32, %v1601_v31  ;;  %v1606_v39 = vld [vmem:[%s5013_s26 + $0x48] sm:$0xff]  ;;  %v1608_v42 = vld [vmem:[%s5013_s26 + $0x58] sm:$0xff] }
 0x12b   : > { %v1123_v43 = vmax.f32 %v1121_v40, 0.0  ;;  %v1122_v45 = vadd.f32 %v3302_v36, %v1113_v41  ;;  %v1604_v36 = vld [vmem:[%s5013_s26 + $0x38] sm:$0xff]  ;;  %v3977_v40 = vpack.c.bf16 %v1606_v39, %v1605_v38  ;;  %v1607_v41 = vld [vmem:[%s5013_s26 + $0x50] sm:$0xff] }
 0x12c   : > { %v3974_v37 = vpack.c.bf16 %v1604_v36, %v1603_v34 }
 0x12d   : > { %v3479_v46 = vpack.c.bf16 %v1123_v43, %v1123_v43  ;;  %v1124_v47 = vmax.f32 %v1122_v45, 0.0  ;;  %v3980_v43 = vpack.c.bf16 %v1608_v42, %v1607_v41  ;;  %v1609_v45 = vld [vmem:[%s5013_s26 + $0x60] sm:$0xff] }
 0x12f   : > { %v1132_v48 = vshrl.u32 %v3479_v46, 16  ;;  %v3480_v49 = vpack.c.bf16 %v1124_v47, %v1124_v47  ;;  %v1135_v51 = vshll.u32 %v3479_v46, 16  ;;  %v1610_v46 = vld [vmem:[%s5013_s26 + $0x68] sm:$0xff] }
 0x130   : > { %v3983_v47 = vpack.c.bf16 %v1610_v46, %v1609_v45  ;;  %v4075_v46 = vld [vmem:[%s5018_s25 + $0x8] sm:$0xff]  }
 0x131   : > { %v1134_v50 = vrot.slane %v1132_v48, 7  ;;  %v1140_v52 = vshrl.u32 %v3480_v49, 16  ;;  %v1143_v55 = vshll.u32 %v3480_v49, 16  ;;  %v1611_v48 = vld [vmem:[%s5013_s26 + $0x70] sm:$0xff]  ;;  %v1612_v49 = vld [vmem:[%s5013_s26 + $0x78] sm:$0xff] }
 0x133   : > { %v1137_v53 = vor.u32 %v1135_v51, %v1134_v50  ;;  %v1142_v54 = vrot.slane %v1140_v52, 7  ;;  %v1138_v57 = vrot.slane %v1134_v50, 4  ;;  %v3986_v50 = vpack.c.bf16 %v1612_v49, %v1611_v48  ;;  %v4077_v48 = vld [vmem:[%s5018_s25 + $0x18] sm:$0xff]   ;;  %v4078_v49 = vld [vmem:[%s5018_s25 + $0x40] sm:$0xff]  }
 0x135   : > { %v1151_v58 = vsel %vm4347_vm9, %v1137_v53, %v4368_v44  ;;  %v1145_v59 = vor.u32 %v1143_v55, %v1142_v54  ;;  %v1147_v60 = vrot.slane %v1142_v54, 4  ;;  %vm2734_vm9 = vcmask 123905  }
 0x136   : > { %1152 = vst [vmem:[#allocation2] sm:$0xf] %v1151_v58 }
 0x137   : > { %v1146_v61 = vsel %vm4337_vm8, %v1138_v57, %v1145_v59  ;;  %v1155_v62 = vsel %vm4316_vm3, %v1147_v60, %v1154_v56  ;;  %vm1769_vm3 = vcmask 523264   ;;  %vm2474_vm8 = vcmask 60416  }
 0x138   : > { %1153 = vst [vmem:[#allocation2 + $0x4] sm:$0xf] %v1146_v61  ;;  %1156 = vst [vmem:[#allocation2 + $0x8] sm:$0x1] %v1155_v62  ;;  %v3364_v62 = vld [vmem:[%s5014_s27] ss:$0 sm:$0xff] }
 0x139   : > { %s3240_s27 = sshll.u32 %s5022_s30, 2  ;;  %s4127_s30 = smov 32  }
 0x13d   : > { %v1157_v63 = vld [vmem:[#allocation2] sm:$0xf] }
 0x13e   : > { %v1393_v17 = vld [vmem:[#allocation2] sm:$0xe] }
 0x13f   : > { %v1158_v0 = vld [vmem:[#allocation2 + $0x4] sm:$0xf]  ;;  %v4059_v3 = vld [vmem:[#allocation2 + $0x8] ss:$0 sps:$4 sm:$0x11]  }
 0x140   : > { %v3321_v2 = vcombine.low %v1157_v63, %v1158_v0  ;;  %v1209_v5 = vshll.u32 %v4059_v3, 16  ;;  %v3355_v18 = vcombine.low %v1393_v17, %v1158_v0  ;;  %v1415_v21 = vrot.slane %v4059_v3, 1  ;;  %v4069_v17 = vld [vmem:[%s5018_s25 + $0x20] sm:$0xff]  }
 0x142   : > { %3724 = vmatmul.mubr.bf16.vlgmr.msra.gmra.mrb[8].mxu0 %v3321_v2  ;;  %v1204_v4 = vshll.u32 %v3321_v2, 16  ;;  %v1202_v35 = vshrl.u32 %v3321_v2, 16  ;;  %v1211_v27 = vrot.slane %v1209_v5, 1  ;;  %v1414_v20 = vrot.slane %v3355_v18, 1  ;;  %v4070_v18 = vld [vmem:[%s5018_s25 + $0x28] sm:$0xff]  }
 0x143   : > { %3751 = vmatprep.mubr.msk.f32.mxu0 %vm4123_vm0, %v4122_v1 }
 0x144   : > { %v1206_v44 = vrot.slane %v1204_v4, 1  ;;  %v1416_v22 = vsel %vm1018_vm11, %v1414_v20, %v1415_v21  ;;  %v4072_v20 = vld [vmem:[%s5018_s25 + $0x38] sm:$0xff]   ;;  %vm2762_vm11 = vcmask 125955  }
 0x146   : > { %v1207_v6 = vor.u32 %v1206_v44, %v1202_v35 }
 0x148   : > { %v1212_v7 = vsel %vm804_vm10, %v1207_v6, %v1211_v27  ;;  %vm2748_vm10 = vcmask 124930  }
 0x149   : > { %3704 = vmatmul.mubr.bf16.vlgmr.msra.gmra.mrb[4].mxu1 %v1212_v7 }
 0x14a   : > { %3728 = vmatpush3.bf16.msra.mxu1 %v4060_v15  ;;  %3743 = vmatprep.mubr.msk.bf16.mxu1 %vm4123_vm0, %v4122_v1 }
 0x14b   : > { %3729 = vmatprep.subr.bf16.mxu1 %v4122_v1 }
 0x14e   : > { %3730 = vmatpush3.bf16.msra.mxu1 %v4061_v8  ;;  %v1522_v8 = vld [vmem:[%s5015_s3] sm:$0xff]  ;;  %s4930_s3 = scalar_lea.vmem %s4990_s23, %s3240_s27 }
 0x14f   : > { %3731 = vmatprep.subr.bf16.mxu1 %v4122_v1 }
 0x152   : > { %3732 = vmatpush3.bf16.msra.mxu1 %v4062_v9 }
 0x153   : > { %3733 = vmatprep.subr.bf16.mxu1 %v4122_v1 }
 0x156   : > { %3734 = vmatpush3.bf16.msra.mxu1 %v4063_v10  ;;  %v1685_v10 = vld [vmem:[#allocation3] sm:$0x1] }
 0x157   : > { %3735 = vmatprep.subr.bf16.mxu1 %v4122_v1 }
 0x15a   : > { %3736 = vmatpush3.bf16.msra.mxu1 %v4064_v13  ;;  %v1689_v13 = vld [vmem:[#allocation3 + $0x4] sm:$0x1] }
 0x15b   : > { %3737 = vmatprep.subr.bf16.mxu1 %v4122_v1 }
 0x15e   : > { %3738 = vmatpush3.bf16.msra.mxu1 %v4065_v14  ;;  %v1686_v14 = vsel %vm4599_vm14, 0, %v1685_v10 }
 0x15f   : > { %3739 = vmatprep.subr.bf16.mxu1 %v4122_v1  ;;  %1687 = vst [vmem:[#allocation3] sm:$0x1] %v1686_v14 }
 0x162   : > { %3740 = vmatpush3.bf16.msra.mxu1 %v4066_v16  ;;  %v1690_v16 = vsel %vm1688_vm15, 0, %v1689_v13  ;;  %vm3098_vm15 = vcmask 518402  }
 0x163   : > { %3741 = vmatprep.subr.bf16.mxu1 %v4122_v1  ;;  %1691 = vst [vmem:[#allocation3 + $0x4] sm:$0x1] %v1690_v16 }
 0x166   : > { %3742 = vmatpush3.bf16.msra.mxu1 %v4067_v19  ;;  %v4071_v19 = vld [vmem:[%s5018_s25 + $0x30] sm:$0xff]  }
 0x167   : > { %3964 = vmatprep.subr.bf16.mxu1 %v4124_v23 }
 0x169   : > { %3744 = vmatmul.mubr.bf16.vlgmr.msra.gmra.mrb[8].mxu1 %v1416_v22 }
 0x16a   : > { %3786 = vmatprep.mubr.msk.f32.mxu1 %vm4123_vm0, %v4122_v1  ;;  %3966 = vmatpush3.bf16.msra.mxu1 %v3965_v28  ;;  %v1711_v31 = vld [vmem:[#allocation3 + $0x4] sm:$0x1] }
 0x16b   : > { %3967 = vmatprep.subr.bf16.mxu1 %v4124_v23 }
 0x16e   : > { %3969 = vmatpush3.bf16.msra.mxu1 %v3968_v30  ;;  %v1708_v30 = vld [vmem:[#allocation3] sm:$0xf] }
 0x16f   : > { %3970 = vmatprep.subr.bf16.mxu1 %v4124_v23 }
 0x172   : > { %3972 = vmatpush3.bf16.msra.mxu1 %v3971_v33 }
 0x173   : > { %3973 = vmatprep.subr.bf16.mxu1 %v4124_v23 }
 0x176   : > { %3975 = vmatpush3.bf16.msra.mxu1 %v3974_v37 }
 0x177   : > { %3976 = vmatprep.subr.bf16.mxu1 %v4124_v23 }
 0x17a   : > { %3978 = vmatpush3.bf16.msra.mxu1 %v3977_v40 }
 0x17b   : > { %3979 = vmatprep.subr.bf16.mxu1 %v4124_v23 }
 0x17e   : > { %3981 = vmatpush3.bf16.msra.mxu1 %v3980_v43  ;;  %v4074_v43 = vld [vmem:[%s5018_s25] sm:$0xff]  }
 0x17f   : > { %3982 = vmatprep.subr.bf16.mxu1 %v4124_v23 }
 0x182   : > { %3984 = vmatpush3.bf16.msra.mxu1 %v3983_v47  ;;  %v4076_v47 = vld [vmem:[%s5018_s25 + $0x10] sm:$0xff]  }
 0x183   : > { %3985 = vmatprep.subr.bf16.mxu1 %v4124_v23 }
 0x186   : > { %3987 = vmatpush3.bf16.msra.mxu1 %v3986_v50  ;;  %v4079_v50 = vld [vmem:[%s5018_s25 + $0x48] sm:$0xff]  }
 0x187   : > { %3837 = vmatprep.subr.bf16.mxu1 %v4122_v1 }
 0x215   : > { %v1386_v51 = vpop.f32.mrb[8].mxu0 }
 0x216   : > { %v3725_v52 = vpop.f32.mrb[9].mxu0 }
 0x217   : > { %v1389_v53 = vpop.f32.mrb[10].mxu0 }
 0x218   : > { %v3726_v54 = vpop.f32.mrb[11].mxu0 }
 0x21c   : > { %v1296_v55 = vpop.f32.mrb[4].mxu1 }
 0x21d   : > { %v1387_v56 = vadd.f32 %v1386_v51, %v1296_v55  ;;  %v3705_v57 = vpop.f32.mrb[5].mxu1  ;;  %v4080_v51 = vld [vmem:[%s5018_s25 + $0x50] sm:$0xff]  }
 0x21e   : > { %v1299_v58 = vpop.f32.mrb[6].mxu1  ;;  %v4084_v57 = vld [vmem:[%s4976_s9 + $0x8] sm:$0xff]  }
 0x21f   : > { %v1390_v59 = vadd.f32 %v1389_v53, %v1299_v58  ;;  %v3706_v60 = vpop.f32.mrb[7].mxu1  ;;  %v4081_v53 = vld [vmem:[%s5018_s25 + $0x58] sm:$0xff]   ;;  %v4085_v58 = vld [vmem:[%s4976_s9 + $0x20] sm:$0xff]  }
 0x220   : > { %v4087_v60 = vld [vmem:[%s4976_s9 + $0x28] sm:$0xff]  }
 0x23c   : > { %v1500_v61 = vpop.f32.mrb[8].mxu1 }
 0x23d   : > { %v1507_v63 = vadd.f32 %v1500_v61, %v1387_v56  ;;  %v3745_v0 = vpop.f32.mrb[9].mxu1  ;;  %v4083_v56 = vld [vmem:[%s4976_s9] sm:$0xff]   ;;  %v4088_v61 = vld [vmem:[%s4976_s9 + $0x18] sm:$0xff]  }
 0x23e   : > { %v1503_v2 = vpop.f32.mrb[10].mxu1 }
 0x23f   : > { %v1516_v3 = vadd.f32 %v3364_v62, %v1507_v63  ;;  %v1508_v4 = vadd.f32 %v1503_v2, %v1390_v59  ;;  %v3746_v5 = vpop.f32.mrb[11].mxu1  ;;  %v4086_v59 = vld [vmem:[%s4976_s9 + $0x10] sm:$0xff]   ;;  %v4092_v63 = vld [vmem:[%s4976_s9 + $0x38] sm:$0xff]  }
 0x241   : > { %v1518_v35 = vmax.f32 %v1516_v3, 0.0  ;;  %v1517_v44 = vadd.f32 %v3364_v62, %v1508_v4  ;;  %v4089_v62 = vld [vmem:[%s4976_s9 + $0x30] sm:$0xff]  }
 0x243   : > { %v1519_v6 = vmax.f32 %v1517_v44, 0.0  ;;  %v1520_v27 = vadd.f32 %v1518_v35, %v4307_v11 }
 0x245   : > { %v1521_v15 = vadd.f32 %v1519_v6, %v4309_v12  ;;  %v4094_v12 = vld [vmem:[%s4976_s9 + $0x48] sm:$0xff]  }
 0x247   : > { %v4586_v7 = vpack.c.bf16 %v1521_v15, %v1520_v27 }
 0x249   : > { %3963 = vmatpush3.bf16.msra.mxu0 %v4586_v7 }
 0x24a   : > { %3789 = vmatprep.subr.bf16.mxu0 %v4122_v1 }
 0x24c   : > { %3752 = vmatmul.mubr.msk.f32.vlgmr.msra.gmra.mrb[12].mxu0 %vm1523_vm12, %v1522_v8  ;;  %v3400_v8 = vld [vmem:[%s4975_s8] ss:$0 sm:$0xff] }
 0x24d   : > { %3797 = vmatprep.mubr.msk.bf16.mxu0 %vm4123_vm0, %v4122_v1  ;;  %3790 = vmatpush3.bf16.msra.mxu0 %v4069_v17 }
 0x24e   : > { %3791 = vmatprep.subr.bf16.mxu0 %v4122_v1 }
 0x251   : > { %3792 = vmatpush3.bf16.msra.mxu0 %v4070_v18 }
 0x252   : > { %3793 = vmatprep.subr.bf16.mxu0 %v4122_v1 }
 0x255   : > { %3794 = vmatpush3.bf16.msra.mxu0 %v4071_v19 }
 0x256   : > { %3795 = vmatprep.subr.bf16.mxu0 %v4122_v1 }
 0x259   : > { %3796 = vmatpush3.bf16.msra.mxu0 %v4072_v20 }
 0x25a   : > { %3801 = vmatprep.subr.bf16.mxu0 %v4122_v1 }
 0x31f   : > { %v1593_v9 = vpop.f32.mrb[12].mxu0 }
 0x320   : > { %v3753_v11 = vpop.f32.mrb[13].mxu0  ;;  %3787 = vmatmul.mubr.f32.vlgmr.msra.gmra.mrb[12].mxu1 %v1593_v9 }
 0x321   : > { %3845 = vmatprep.mubr.msk.bf16.mxu1 %vm4123_vm0, %v4122_v1  ;;  %3838 = vmatpush3.bf16.msra.mxu1 %v4083_v56 }
 0x322   : > { %3839 = vmatprep.subr.bf16.mxu1 %v4122_v1 }
 0x325   : > { %3840 = vmatpush3.bf16.msra.mxu1 %v4084_v57 }
 0x326   : > { %3841 = vmatprep.subr.bf16.mxu1 %v4122_v1 }
 0x329   : > { %3842 = vmatpush3.bf16.msra.mxu1 %v4086_v59 }
 0x32a   : > { %3843 = vmatprep.subr.bf16.mxu1 %v4122_v1 }
 0x32d   : > { %3844 = vmatpush3.bf16.msra.mxu1 %v4088_v61 }
 0x32e   : > { %3861 = vmatprep.subr.mxu1 %v4122_v1 }
 0x3f3   : > { %v4622_v21 = vpop.f32.mrb[12].mxu1 }
 0x3f4   : > { %v3481_v22 = vpack.c.bf16 %v4622_v21, %v4622_v21  ;;  %v3788_v24 = vpop.f32.mrb[13].mxu1 }
 0x3f6   : > { %v1697_v25 = vshrl.u32 %v3481_v22, 16  ;;  %v1700_v28 = vshll.u32 %v3481_v22, 16 }
 0x3f8   : > { %v1699_v26 = vrot.slane %v1697_v25, 7 }
 0x3fa   : > { %v1702_v32 = vor.u32 %v1700_v28, %v1699_v26  ;;  %v1703_v33 = vrot.slane %v1699_v26, 4 }
 0x3fc   : > { %v1709_v34 = vsel %vm4627_vm2, %v1702_v32, %v1708_v30  ;;  %v1712_v36 = vsel %vm4599_vm14, %v1703_v33, %v1711_v31 }
 0x3fd   : > { %1710 = vst [vmem:[#allocation3] sm:$0xf] %v1709_v34  ;;  %1713 = vst [vmem:[#allocation3 + $0x4] sm:$0x1] %v1712_v36 }
 0x404   : > { %v4635_v37 = vld [vmem:[#allocation3] sm:$0xf]  ;;  %v1723_v38 = vld [vmem:[#allocation3 + $0x4] sm:$0x1] }
 0x405   : > { %v3375_v39 = vcombine.low %v4635_v37, %v1723_v38  ;;  %v1880_v52 = vld [vmem:[#allocation3] sm:$0xe]  ;;  %v1987_v25 = vld [vmem:[#allocation3 + $0x4] sm:$0x1] }
 0x406   : > { %v3394_v54 = vcombine.low %v1880_v52, %v1723_v38  ;;  %v4095_v38 = vld [vmem:[%s4976_s9 + $0x50] sm:$0xff]  }
 0x407   : > { %v1741_v40 = vshll.u32 %v3375_v39, 16  ;;  %v1739_v41 = vshrl.u32 %v3375_v39, 16 }
 0x408   : > { %v1893_v55 = vrot.slane %v3394_v54, 1  ;;  %v2329_v54 = vld [vmem:[%s4979_s12 + $0x38] sm:$0xff] }
 0x409   : > { %v1743_v42 = vrot.slane %v1741_v40, 1  ;;  %v4096_v40 = vld [vmem:[%s4976_s9 + $0x58] sm:$0xff]  }
 0x40b   : > { %v1744_v45 = vor.u32 %v1743_v42, %v1739_v41 }
 0x40d   : > { %3798 = vmatmul.mubr.msk.bf16.vlgmr.msra.gmra.mrb[16].mxu0 %vm1769_vm3, %v1744_v45  ;;  %v2323_v45 = vld [vmem:[%s4979_s12 + $0x8] sm:$0xff] }
 0x40e   : > { %3802 = vmatpush3.bf16.msra.mxu0 %v4074_v43  ;;  %3809 = vmatprep.mubr.msk.bf16.mxu0 %vm4123_vm0, %v4122_v1  ;;  %v2322_v43 = vld [vmem:[%s4979_s12] sm:$0xff] }
 0x40f   : > { %3803 = vmatprep.subr.bf16.mxu0 %v4122_v1 }
 0x412   : > { %3804 = vmatpush3.bf16.msra.mxu0 %v4075_v46  ;;  %v2324_v46 = vld [vmem:[%s4979_s12 + $0x10] sm:$0xff] }
 0x413   : > { %3805 = vmatprep.subr.bf16.mxu0 %v4122_v1 }
 0x416   : > { %3806 = vmatpush3.bf16.msra.mxu0 %v4076_v47  ;;  %v3989_v47 = vpack.c.bf16 %v2323_v45, %v2322_v43 }
 0x417   : > { %3807 = vmatprep.subr.bf16.mxu0 %v4122_v1 }
 0x41a   : > { %3808 = vmatpush3.bf16.msra.mxu0 %v4077_v48  ;;  %v2325_v48 = vld [vmem:[%s4979_s12 + $0x18] sm:$0xff] }
 0x41b   : > { %3813 = vmatprep.subr.bf16.mxu0 %v4122_v1 }
 0x41d   : > { %3810 = vmatmul.mubr.msk.bf16.vlgmr.msra.gmra.mrb[20].mxu0 %vm1769_vm3, %v4635_v37 }
 0x41e   : > { %3814 = vmatpush3.bf16.msra.mxu0 %v4078_v49  ;;  %3821 = vmatprep.mubr.msk.bf16.mxu0 %vm4123_vm0, %v4122_v1  ;;  %v3992_v49 = vpack.c.bf16 %v2325_v48, %v2324_v46 }
 0x41f   : > { %3815 = vmatprep.subr.bf16.mxu0 %v4122_v1 }
 0x422   : > { %3816 = vmatpush3.bf16.msra.mxu0 %v4079_v50  ;;  %v2326_v50 = vld [vmem:[%s4979_s12 + $0x20] sm:$0xff] }
 0x423   : > { %3817 = vmatprep.subr.bf16.mxu0 %v4122_v1 }
 0x426   : > { %3818 = vmatpush3.bf16.msra.mxu0 %v4080_v51  ;;  %v2327_v51 = vld [vmem:[%s4979_s12 + $0x28] sm:$0xff] }
 0x427   : > { %3819 = vmatprep.subr.bf16.mxu0 %v4122_v1  ;;  %v3995_v52 = vpack.c.bf16 %v2327_v51, %v2326_v50 }
 0x42a   : > { %3820 = vmatpush3.bf16.msra.mxu0 %v4081_v53  ;;  %v2328_v53 = vld [vmem:[%s4979_s12 + $0x30] sm:$0xff] }
 0x42b   : > { %3825 = vmatprep.subr.bf16.mxu0 %v4122_v1 }
 0x42d   : > { %3822 = vmatmul.mubr.msk.bf16.vlgmr.msra.gmra.mrb[24].mxu0 %vm1769_vm3, %v1893_v55  ;;  %v3998_v55 = vpack.c.bf16 %v2329_v54, %v2328_v53 }
 0x42e   : > { %3833 = vmatprep.mubr.msk.bf16.mxu0 %vm4123_vm0, %v4122_v1  ;;  %3826 = vmatpush3.bf16.msra.mxu0 %v4085_v58 }
 0x42f   : > { %3827 = vmatprep.subr.bf16.mxu0 %v4122_v1 }
 0x432   : > { %3828 = vmatpush3.bf16.msra.mxu0 %v4087_v60 }
 0x433   : > { %3829 = vmatprep.subr.bf16.mxu0 %v4122_v1 }
 0x436   : > { %3830 = vmatpush3.bf16.msra.mxu0 %v4089_v62 }
 0x437   : > { %3831 = vmatprep.subr.bf16.mxu0 %v4122_v1 }
 0x43a   : > { %3832 = vmatpush3.bf16.msra.mxu0 %v4092_v63 }
 0x43b   : > { %3849 = vmatprep.subr.bf16.mxu0 %v4122_v1 }
 0x4e0   : > { %v1807_v0 = vpop.f32.mrb[16].mxu0 }
 0x4e1   : > { %v3799_v2 = vpop.f32.mrb[17].mxu0 }
 0x4e2   : > { %v1810_v3 = vpop.f32.mrb[18].mxu0 }
 0x4e3   : > { %v3800_v4 = vpop.f32.mrb[19].mxu0  ;;  %v3435_v3 = vld [vmem:[%s4977_s10] ss:$0 sm:$0xff] }
 0x4f0   : > { %v1874_v5 = vpop.f32.mrb[20].mxu0 }
 0x4f1   : > { %v1875_v35 = vadd.f32 %v1874_v5, %v1807_v0  ;;  %v3811_v44 = vpop.f32.mrb[21].mxu0 }
 0x4f2   : > { %v1877_v6 = vpop.f32.mrb[22].mxu0 }
 0x4f3   : > { %v3812_v27 = vpop.f32.mrb[23].mxu0 }
 0x500   : > { %v1955_v15 = vpop.f32.mrb[24].mxu0 }
 0x501   : > { %v1961_v9 = vadd.f32 %v1955_v15, %v1875_v35  ;;  %v3823_v11 = vpop.f32.mrb[25].mxu0  ;;  %v2247_v15 = vld [vmem:[%s4978_s11] sm:$0xf] }
 0x502   : > { %v1958_v10 = vpop.f32.mrb[26].mxu0  ;;  %v4098_v11 = vld [vmem:[%s4980_s13 + $0x8] sm:$0xff]  }
 0x503   : > { %v1969_v13 = vadd.f32 %v3400_v8, %v1961_v9  ;;  %v3824_v14 = vpop.f32.mrb[27].mxu0  ;;  %v4097_v8 = vld [vmem:[%s4980_s13] sm:$0xff]  }
 0x505   : > { %v1970_v16 = vmax.f32 %v1969_v13, 0.0 }
 0x507   : > { %v3482_v17 = vpack.c.bf16 %v1970_v16, %v1970_v16  ;;  %v2478_v16 = vld [vmem:[%s4982_s15] sm:$0xf] }
 0x509   : > { %v1976_v18 = vshrl.u32 %v3482_v17, 16  ;;  %v1979_v20 = vshll.u32 %v3482_v17, 16  ;;  %v3442_v17 = vld [vmem:[%s4982_s15 + $0x4] sm:$0xf] }
 0x50b   : > { %v1978_v19 = vrot.slane %v1976_v18, 7  ;;  %v2534_v18 = vsel %vm751_vm7, %v2478_v16, 0 }
 0x50d   : > { %v1981_v22 = vor.u32 %v1979_v20, %v1978_v19  ;;  %v1982_v24 = vrot.slane %v1978_v19, 4  ;;  %v2488_v19 = vsel %vm751_vm7, %v3442_v17, 0  ;;  %v3438_v20 = vld [vmem:[%s4981_s14] ss:$0 sm:$0xff] }
 0x50f   : > { %v1985_v26 = vsel %vm4627_vm2, %v1981_v22, %v4635_v37  ;;  %v1988_v28 = vsel %vm4599_vm14, %v1982_v24, %v1987_v25  ;;  %vm3123_vm14 = vcmask 258052   ;;  %vm3160_vm2 = vcmask 522502  }
 0x510   : > { %1986 = vst [vmem:[#allocation3] sm:$0xf] %v1985_v26  ;;  %1989 = vst [vmem:[#allocation3 + $0x4] sm:$0x1] %v1988_v28 }
 0x517   : > { %v1990_v30 = vld [vmem:[#allocation3] sm:$0xf]  ;;  %v1999_v31 = vld [vmem:[#allocation3 + $0x4] sm:$0x1] }
 0x518   : > { %v3410_v32 = vcombine.low %v1990_v30, %v1999_v31  ;;  %3846 = vmatmul.mubr.msk.bf16.vlgmr.msra.gmra.mrb[16].mxu1 %vm1769_vm3, %v1990_v30  ;;  %v2155_v39 = vld [vmem:[#allocation3] sm:$0xe]  ;;  %v3445_v30 = vld [vmem:[%s4982_s15 + $0x8] sm:$0xf] }
 0x519   : > { %3863 = vmatprep.mubr.msk.f32.mxu1 %vm4123_vm0, %v4122_v1  ;;  %v3429_v41 = vcombine.low %v2155_v39, %v1999_v31 }
 0x51a   : > { %v2017_v33 = vshll.u32 %v3410_v32, 16  ;;  %v2015_v34 = vshrl.u32 %v3410_v32, 16 }
 0x51b   : > { %v2168_v42 = vrot.slane %v3429_v41, 1 }
 0x51c   : > { %v2019_v36 = vrot.slane %v2017_v33, 1  ;;  %v4099_v33 = vld [vmem:[%s4984_s17] sm:$0xff]  }
 0x51e   : > { %v2020_v37 = vor.u32 %v2019_v36, %v2015_v34 }
 0x520   : > { %3834 = vmatmul.mubr.msk.bf16.vlgmr.msra.gmra.mrb[28].mxu0 %vm1769_vm3, %v2020_v37  ;;  %v4100_v37 = vld [vmem:[%s4984_s17 + $0x8] sm:$0xff]  }
 0x521   : > { %3850 = vmatpush3.bf16.msra.mxu0 %v4093_v29  ;;  %3857 = vmatprep.mubr.msk.bf16.mxu0 %vm4123_vm0, %v4122_v1  ;;  %v2584_v29 = vsel %vm751_vm7, %v3445_v30, 0  ;;  %vm2719_vm7 = vcmask 122880  }
 0x522   : > { %3851 = vmatprep.subr.bf16.mxu0 %v4122_v1  ;;  %2774 = vst.msk [vmem:[#allocation5] sm:$0x1] %vm2719_vm7, %v4122_v1  ;;  %2775 = vst.msk [vmem:[#allocation5 + $0x9] sm:$0x1] %vm2719_vm7, %v4122_v1 }
 0x525   : > { %3852 = vmatpush3.bf16.msra.mxu0 %v4094_v12 }
 0x526   : > { %3853 = vmatprep.subr.bf16.mxu0 %v4122_v1 }
 0x529   : > { %3854 = vmatpush3.bf16.msra.mxu0 %v4095_v38  ;;  %v4101_v38 = vld [vmem:[%s4984_s17 + $0x10] sm:$0xff]  }
 0x52a   : > { %3855 = vmatprep.subr.bf16.mxu0 %v4122_v1 }
 0x52d   : > { %3856 = vmatpush3.bf16.msra.mxu0 %v4096_v40  ;;  %v4102_v40 = vld [vmem:[%s4984_s17 + $0x18] sm:$0xff]  }
 0x52e   : > { %3988 = vmatprep.subr.bf16.mxu0 %v4124_v23 }
 0x530   : > { %3858 = vmatmul.mubr.msk.bf16.vlgmr.msra.gmra.mrb[32].mxu0 %vm1769_vm3, %v2168_v42 }
 0x531   : > { %3882 = vmatprep.mubr.msk.f32.mxu0 %vm4123_vm0, %v4122_v1  ;;  %3990 = vmatpush3.bf16.msra.mxu0 %v3989_v47 }
 0x532   : > { %3991 = vmatprep.subr.bf16.mxu0 %v4124_v23 }
 0x535   : > { %3993 = vmatpush3.bf16.msra.mxu0 %v3992_v49 }
 0x536   : > { %3994 = vmatprep.subr.bf16.mxu0 %v4124_v23 }
 0x539   : > { %3996 = vmatpush3.bf16.msra.mxu0 %v3995_v52 }
 0x53a   : > { %3997 = vmatprep.subr.bf16.mxu0 %v4124_v23 }
 0x53d   : > { %3999 = vmatpush3.bf16.msra.mxu0 %v3998_v55 }
 0x53e   : > { %3899 = vmatprep.subr.bf16.mxu0 %v4122_v1 }
 0x5eb   : > { %v2149_v56 = vpop.f32.mrb[16].mxu1 }
 0x5ec   : > { %v3847_v57 = vpop.f32.mrb[17].mxu1 }
 0x5ed   : > { %v2152_v58 = vpop.f32.mrb[18].mxu1  ;;  %v3448_v57 = vld [vmem:[%s4985_s18] ss:$0 sm:$0xff] }
 0x5ee   : > { %v3848_v59 = vpop.f32.mrb[19].mxu1  ;;  %v3447_v58 = vld [vmem:[%s4983_s16] ss:$0 sm:$0xff] }
 0x5f3   : > { %v2082_v60 = vpop.f32.mrb[28].mxu0 }
 0x5f4   : > { %v2150_v61 = vadd.f32 %v2149_v56, %v2082_v60  ;;  %v3835_v62 = vpop.f32.mrb[29].mxu0 }
 0x5f5   : > { %v2085_v63 = vpop.f32.mrb[30].mxu0 }
 0x5f6   : > { %v3836_v0 = vpop.f32.mrb[31].mxu0 }
 0x603   : > { %v2230_v2 = vpop.f32.mrb[32].mxu0 }
 0x604   : > { %v2236_v4 = vadd.f32 %v2230_v2, %v2150_v61  ;;  %v3859_v5 = vpop.f32.mrb[33].mxu0 }
 0x605   : > { %v2233_v23 = vpop.f32.mrb[34].mxu0 }
 0x606   : > { %v2244_v35 = vadd.f32 %v3435_v3, %v2236_v4  ;;  %v3860_v44 = vpop.f32.mrb[35].mxu0 }
 0x608   : > { %v2245_v6 = vmax.f32 %v2244_v35, 0.0 }
 0x60a   : > { %v4777_v27 = vadd.f32 %v2245_v6, %v4622_v21 }
 0x60c   : > { %3862 = vmatpush3.msra.mxu1 %v4777_v27  ;;  %v2635_v41 = vpack.c.bf16 %v4777_v27, %v4777_v27  ;;  %v4103_v27 = vld [vmem:[%s4986_s19 + $0x8] sm:$0xff]  }
 0x60d   : > { %3864 = vmatmul.mubr.msk.f32.vlgmr.msra.gmra.mrb[14].mxu1 %vm2248_vm4, %v2247_v15  ;;  %3885 = vmatprep.subr.bf16.mxu1 %v4122_v1  ;;  %v4104_v15 = vld [vmem:[%s4986_s19 + $0x10] sm:$0xff]  }
 0x60e   : > { %3889 = vmatprep.mubr.msk.bf16.mxu1 %vm4123_vm0, %v4122_v1  ;;  %3886 = vmatpush3.bf16.msra.mxu1 %v4097_v8 }
 0x60f   : > { %3887 = vmatprep.subr.bf16.mxu1 %v4122_v1 }
 0x612   : > { %3888 = vmatpush3.bf16.msra.mxu1 %v4098_v11 }
 0x613   : > { %3893 = vmatprep.subr.bf16.mxu1 %v4122_v1 }
 0x6e0   : > { %v2318_v21 = vpop.f32.mrb[14].mxu1 }
 0x6e1   : > { %3883 = vmatmul.mubr.msk.f32.vlgmr.msra.gmra.mrb[14].mxu0 %vm1769_vm3, %v2318_v21  ;;  %v3865_v9 = vpop.f32.mrb[15].mxu1 }
 0x6e2   : > { %3901 = vmatprep.mubr.msk.bf16.mxu0 %vm4123_vm0, %v4122_v1  ;;  %3900 = vmatpush3.bf16.msra.mxu0 %v2534_v18 }
 0x6e3   : > { %3911 = vmatprep.subr.bf16.mxu0 %v4122_v1 }
 0x7b4   : > { %v2399_v10 = vpop.f32.mrb[14].mxu0 }
 0x7b5   : > { %v2403_v13 = vpack.c.bf16 %v2399_v10, %v2399_v10  ;;  %v3884_v14 = vpop.f32.mrb[15].mxu0 }
 0x7b7   : > { %3890 = vmatmul.mubr.msk.bf16.vlgmr.msra.gmra.mrb[20].mxu1 %vm2427_vm5, %v2403_v13  ;;  %vm3076_vm5 = vcmask 779777  }
 0x7b8   : > { %3895 = vmatprep.mubr.msk.bf16.mxu1 %vm4123_vm0, %v4122_v1  ;;  %3894 = vmatpush3.bf16.msra.mxu1 %v2488_v19 }
 0x7b9   : > { %3905 = vmatprep.subr.bf16.mxu1 %v4122_v1 }
 0x88a   : > { %v2465_v22 = vpop.f32.mrb[20].mxu1 }
 0x88b   : > { %v2466_v24 = vadd.f32 %v3438_v20, %v2465_v22  ;;  %v3891_v25 = vpop.f32.mrb[21].mxu1 }
 0x88c   : > { %v2468_v26 = vpop.f32.mrb[22].mxu1  ;;  %v4105_v25 = vld [vmem:[%s4986_s19] sm:$0xff]  }
 0x88d   : > { %2475 = vst.msk [vmem:[#allocation4 + $0x1] sm:$0xf] %vm2474_vm8, %v2466_v24  ;;  %v3892_v28 = vpop.f32.mrb[23].mxu1  ;;  %vm3138_vm8 = vcmask 783877  }
 0x894   : > { %v2479_v31 = vld [vmem:[#allocation4 + $0x1] sm:$0xf] }
 0x895   : > { %v2476_v32 = vld [vmem:[#allocation4] sm:$0xf]  ;;  %v2480_v34 = vpack.c.bf16 %v2479_v31, %v2479_v31  ;;  %v4106_v31 = vld [vmem:[%s4988_s21] sm:$0xff]  }
 0x896   : > { %v2477_v36 = vpack.c.bf16 %v2476_v32, %v2476_v32  ;;  %v2576_v12 = vld [vmem:[#allocation4 + $0x2] sm:$0xf] }
 0x897   : > { %3896 = vmatmul.mubr.msk.bf16.vlgmr.msra.gmra.mrb[24].mxu1 %vm2248_vm4, %v2480_v34  ;;  %v2577_v39 = vpack.c.bf16 %v2576_v12, %v2576_v12  ;;  %v4108_v34 = vld [vmem:[%s4988_s21 + $0x10] sm:$0xff]  }
 0x898   : > { %3902 = vmatmul.mubr.msk.bf16.vlgmr.msra.gmra.mrb[36].mxu0 %vm2248_vm4, %v2477_v36  ;;  %3906 = vmatpush3.bf16.msra.mxu1 %v2584_v29  ;;  %v4109_v36 = vld [vmem:[%s4988_s21 + $0x18] sm:$0xff]   ;;  %v4110_v29 = vld [vmem:[%s4988_s21 + $0x20] sm:$0xff]   ;;  %v4112_v12 = vld [vmem:[%s4988_s21 + $0x30] sm:$0xff]  }
 0x899   : > { %3912 = vmatpush3.bf16.msra.mxu0 %v4099_v33  ;;  %3907 = vmatprep.mubr.msk.bf16.mxu1 %vm4123_vm0, %v4122_v1  ;;  %v4107_v33 = vld [vmem:[%s4988_s21 + $0x8] sm:$0xff]  }
 0x89a   : > { %3913 = vmatprep.subr.bf16.mxu0 %v4122_v1  ;;  %3919 = vmatprep.mubr.msk.bf16.mxu0 %vm4123_vm0, %v4122_v1 }
 0x89b   : > { %3923 = vmatprep.subr.bf16.mxu1 %v4122_v1 }
 0x89d   : > { %3914 = vmatpush3.bf16.msra.mxu0 %v4100_v37  ;;  %v4111_v37 = vld [vmem:[%s4988_s21 + $0x28] sm:$0xff]  }
 0x89e   : > { %3915 = vmatprep.subr.bf16.mxu0 %v4122_v1 }
 0x89f   : > { %3908 = vmatmul.mubr.msk.bf16.vlgmr.msra.gmra.mrb[28].mxu1 %vm2248_vm4, %v2577_v39  ;;  %vm3106_vm4 = vcmask 781827  }
 0x8a0   : > { %3925 = vmatprep.mubr.msk.bf16.mxu1 %vm4123_vm0, %v4122_v1  ;;  %3924 = vmatpush3.bf16.msra.mxu1 %v4103_v27 }
 0x8a1   : > { %3916 = vmatpush3.bf16.msra.mxu0 %v4101_v38  ;;  %3929 = vmatprep.subr.bf16.mxu1 %v4122_v1  ;;  %v4113_v38 = vld [vmem:[%s4988_s21 + $0x38] sm:$0xff]  }
 0x8a2   : > { %3917 = vmatprep.subr.bf16.mxu0 %v4122_v1 }
 0x8a5   : > { %3918 = vmatpush3.bf16.msra.mxu0 %v4102_v40 }
 0x8a6   : > { %3935 = vmatprep.subr.bf16.mxu0 %v4122_v1 }
 0x8a8   : > { %3920 = vmatmul.mubr.msk.bf16.vlgmr.msra.gmra.mrb[40].mxu0 %vm1769_vm3, %v2635_v41  ;;  %vm3130_vm3 = vcmask 520452  }
 0x8a9   : > { %3937 = vmatprep.mubr.msk.bf16.mxu0 %vm4123_vm0, %v4122_v1  ;;  %3936 = vmatpush3.bf16.msra.mxu0 %v4104_v15 }
 0x96a   : > { %v2524_v42 = vpop.f32.mrb[24].mxu1 }
 0x96b   : > { %v2570_v43 = vpop.f32.mrb[36].mxu0  ;;  %v3897_v46 = vpop.f32.mrb[25].mxu1 }
 0x96c   : > { %v2571_v45 = vadd.f32 %v2570_v43, %v2524_v42  ;;  %v3903_v47 = vpop.f32.mrb[37].mxu0  ;;  %v2527_v48 = vpop.f32.mrb[26].mxu1 }
 0x96d   : > { %v2573_v49 = vpop.f32.mrb[38].mxu0  ;;  %v3898_v50 = vpop.f32.mrb[27].mxu1 }
 0x96e   : > { %v3904_v51 = vpop.f32.mrb[39].mxu0 }
 0x972   : > { %v2620_v52 = vpop.f32.mrb[28].mxu1 }
 0x973   : > { %v2626_v53 = vadd.f32 %v2620_v52, %v2571_v45  ;;  %v3909_v54 = vpop.f32.mrb[29].mxu1 }
 0x974   : > { %v2623_v55 = vpop.f32.mrb[30].mxu1 }
 0x975   : > { %v3910_v56 = vpop.f32.mrb[31].mxu1  ;;  %v2634_v62 = vadd.f32 %v3447_v58, %v2626_v53 }
 0x97b   : > { %v2712_v59 = vpop.f32.mrb[40].mxu0 }
 0x97c   : > { %v2713_v60 = vadd.f32 %v3448_v57, %v2712_v59  ;;  %v3921_v61 = vpop.f32.mrb[41].mxu0 }
 0x97d   : > { %v2715_v63 = vpop.f32.mrb[42].mxu0 }
 0x97e   : > { %v3922_v0 = vpop.f32.mrb[43].mxu0  ;;  %v2750_v2 = vrot.slane %v2713_v60, 3  ;;  %v2722_v3 = vrot.slane %v2713_v60, 1  ;;  %v2736_v4 = vrot.slane %v2713_v60, 2  ;;  %v2718_v5 = vadd.f32 %v2713_v60, %v2634_v62 }
 0x97f   : > { %v2764_v6 = vrot.slane %v2713_v60, 4 }
 0x980   : > { %2751 = vrot.lane.b32.xlu1 %v2750_v2, %s4125_s6  ;;  %v2761_v23 = vadd.f32 %v2750_v2, %v2634_v62  ;;  %2723 = vrot.lane.b32.xlu0 %v2722_v3, %s4125_s6  ;;  %v2733_v35 = vadd.f32 %v2722_v3, %v2634_v62  ;;  %v2747_v44 = vadd.f32 %v2736_v4, %v2634_v62 }
 0x981   : > { %2720 = vst.msk [vmem:[#allocation5 + $0x1] sm:$0x1] %vm2719_vm7, %v2718_v5 }
 0x982   : > { %2735 = vst.msk [vmem:[#allocation5 + $0x2] sm:$0x2] %vm2734_vm9, %v2733_v35 }
 0x983   : > { %2749 = vst.msk [vmem:[#allocation5 + $0x3] sm:$0x4] %vm2748_vm10, %v2747_v44 }
 0x984   : > { %2763 = vst.msk [vmem:[#allocation5 + $0x4] sm:$0x8] %vm2762_vm11, %v2761_v23  ;;  %2765 = vrot.lane.b32.xlu1 %v2764_v6, %s4125_s6  ;;  %2737 = vrot.lane.b32.xlu0 %v2736_v4, %s4125_s6 }
 0x9f2   : > { %v2752_v8 = vpop.permute.xlu1 %2751  ;;  %v2724_v21 = vpop.permute.xlu0 %2723 }
 0x9f3   : > { %v2726_v9 = vadd.f32 %v2724_v21, %v2634_v62  ;;  %v2754_v10 = vadd.f32 %v2752_v8, %v2634_v62 }
 0x9f5   : > { %2728 = vrot.lane.b32.xlu0 %v2726_v9, %s4126_s0 }
 0x9f6   : > { %v2738_v11 = vpop.permute.xlu0 %2737  ;;  %v2766_v14 = vpop.permute.xlu1 %2765 }
 0x9f7   : > { %v2740_v13 = vadd.f32 %v2738_v11, %v2634_v62  ;;  %v2768_v16 = vadd.f32 %v2766_v14, %v2634_v62 }
 0x9f9   : > { %2756 = vrot.lane.b32.xlu0 %v2754_v10, %s4126_s0  ;;  %2742 = vrot.lane.b32.xlu1 %v2740_v13, %s4126_s0 }
 0x9fd   : > { %2770 = vrot.lane.b32.xlu1 %v2768_v16, %s4126_s0  ;;  %s4128_s0 = smov 64  }
 0xa67   : > { %v2729_v17 = vpop.permute.xlu0 %2728 }
 0xa68   : > { %2731 = vst.msk [vmem:[#allocation5 + $0x2] sm:$0x1] %vm2719_vm7, %v2729_v17  ;;  %vm3117_vm7 = vcmask 1044227  }
 0xa6b   : > { %v2743_v18 = vpop.permute.xlu1 %2742  ;;  %v2757_v19 = vpop.permute.xlu0 %2756 }
 0xa6c   : > { %2745 = vst.msk [vmem:[#allocation5 + $0x3] sm:$0x2] %vm2734_vm9, %v2743_v18  ;;  %vm3087_vm9 = vcmask 1042177  }
 0xa6d   : > { %2759 = vst.msk [vmem:[#allocation5 + $0x4] sm:$0x4] %vm2748_vm10, %v2757_v19  ;;  %vm3178_vm10 = vcmask 1048327  }
 0xa6f   : > { %v2771_v20 = vpop.permute.xlu1 %2770 }
 0xa70   : > { %2773 = vst.msk [vmem:[#allocation5 + $0x5] sm:$0x8] %vm2762_vm11, %v2771_v20  ;;  %vm3149_vm11 = vcmask 1046277  }
 0xa74   : > { %v2776_v30 = vld [vmem:[#allocation5] sm:$0xff] }
 0xa75   : > { %v2777_v32 = vpack.c.bf16 %v2776_v30, %v2776_v30 }
 0xa77   : > { %v2780_v22 = vld [vmem:[#allocation5 + $0x1] sm:$0xff] }
 0xa78   : > { %v2883_v24 = vld [vmem:[#allocation5 + $0x2] sm:$0xff]  ;;  %v2781_v26 = vpack.c.bf16 %v2780_v22, %v2780_v22 }
 0xa79   : > { %v2884_v28 = vpack.c.bf16 %v2883_v24, %v2883_v24 }
 0xa7a   : > { %3926 = vmatmul.mubr.msk.bf16.vlgmr.msra.gmra.mrb[32].mxu1 %vm1523_vm12, %v2781_v26 }
 0xa7b   : > { %3938 = vmatmul.mubr.msk.bf16.vlgmr.msra.gmra.mrb[44].mxu0 %vm1523_vm12, %v2884_v28  ;;  %3930 = vmatpush3.bf16.msra.mxu1 %v4105_v25 }
 0xa7c   : > { %3931 = vmatprep.mubr.msk.bf16.mxu1 %vm4123_vm0, %v4122_v1  ;;  %3941 = vmatprep.subr.bf16.mxu1 %v4122_v1 }
 0xa82   : > { %3932 = vmatmul.mubr.msk.bf16.vlgmr.msra.gmra.mrb[36].mxu1 %vm1523_vm12, %v2777_v32  ;;  %vm3091_vm12 = vcmask 256002  }
 0xa83   : > { %3942 = vmatpush3.bf16.msra.mxu1 %v4106_v31  ;;  %3957 = vmatprep.mubr.msk.bf16.mxu1 %vm4123_vm0, %v4122_v1  ;;  %vm3060_vm0 = vcmask 253952  }
 0xa84   : > { %3943 = vmatprep.subr.bf16.mxu1 %v4122_v1 }
 0xa87   : > { %3944 = vmatpush3.bf16.msra.mxu1 %v4107_v33 }
 0xa88   : > { %3945 = vmatprep.subr.bf16.mxu1 %v4122_v1 }
 0xa8b   : > { %3946 = vmatpush3.bf16.msra.mxu1 %v4108_v34 }
 0xa8c   : > { %3947 = vmatprep.subr.bf16.mxu1 %v4122_v1 }
 0xa8f   : > { %3948 = vmatpush3.bf16.msra.mxu1 %v4109_v36 }
 0xa90   : > { %3949 = vmatprep.subr.bf16.mxu1 %v4122_v1 }
 0xa93   : > { %3950 = vmatpush3.bf16.msra.mxu1 %v4110_v29 }
 0xa94   : > { %3951 = vmatprep.subr.bf16.mxu1 %v4122_v1 }
 0xa97   : > { %3952 = vmatpush3.bf16.msra.mxu1 %v4111_v37 }
 0xa98   : > { %3953 = vmatprep.subr.bf16.mxu1 %v4122_v1 }
 0xa9b   : > { %3954 = vmatpush3.bf16.msra.mxu1 %v4112_v12 }
 0xa9c   : > { %3955 = vmatprep.subr.bf16.mxu1 %v4122_v1  ;;  %v3464_v1 = vld [vmem:[%s4987_s20] ss:$0 sm:$0xff] }
 0xa9f   : > { %3956 = vmatpush3.bf16.msra.mxu1 %v4113_v38 }
 0xaa2   : > { %3958 = vmatmul.mubr.bf16.vlgmr.msra.gmra.mrb[40].mxu1 %v4586_v7  ;;  %v3465_v7 = vld [vmem:[%s4989_s22] ss:$0 sm:$0xff] }
 0xb4d   : > { %v2828_v39 = vpop.f32.mrb[32].mxu1 }
 0xb4e   : > { %v2931_v40 = vpop.f32.mrb[44].mxu0  ;;  %v3927_v41 = vpop.f32.mrb[33].mxu1 }
 0xb4f   : > { %v3939_v42 = vpop.f32.mrb[45].mxu0  ;;  %v2831_v43 = vpop.f32.mrb[34].mxu1 }
 0xb50   : > { %v2934_v45 = vpop.f32.mrb[46].mxu0  ;;  %v3928_v46 = vpop.f32.mrb[35].mxu1 }
 0xb51   : > { %v3940_v47 = vpop.f32.mrb[47].mxu0 }
 0xb55   : > { %v2877_v48 = vpop.f32.mrb[36].mxu1 }
 0xb56   : > { %v2878_v49 = vadd.f32 %v2877_v48, %v2828_v39  ;;  %v3933_v50 = vpop.f32.mrb[37].mxu1 }
 0xb57   : > { %v2880_v51 = vpop.f32.mrb[38].mxu1 }
 0xb58   : > { %v2937_v52 = vadd.f32 %v2931_v40, %v2878_v49  ;;  %v3934_v53 = vpop.f32.mrb[39].mxu1 }
 0xb5a   : > { %v4925_v55 = vadd.f32 %v3464_v1, %v2937_v52 }
 0xb75   : > { %v3052_v54 = vpop.f32.mrb[40].mxu1 }
 0xb76   : > { %v3053_v56 = vadd.f32 %v3465_v7, %v3052_v54  ;;  %v3959_v57 = vpop.f32.mrb[41].mxu1 }
 0xb77   : > { %v3055_v58 = vpop.f32.mrb[42].mxu1 }
 0xb78   : > { %v3059_v59 = vadd.f32 %v3053_v56, %v4925_v55  ;;  %v3056_v60 = vadd.f32 %v3465_v7, %v3055_v58  ;;  %v3960_v61 = vpop.f32.mrb[43].mxu1  ;;  %v3108_v62 = vrot.slane %v3053_v56, 4  ;;  %v3078_v63 = vrot.slane %v3053_v56, 2 }
 0xb79   : > { %v3093_v23 = vrot.slane %v3053_v56, 3  ;;  %v3063_v35 = vrot.slane %v3053_v56, 1 }
 0xb7a   : > { %v3120_v0 = vrot.slane %v3056_v60, 4  ;;  %3109 = vrot.lane.b32.xlu1 %v3108_v62, %s4127_s30  ;;  %3079 = vrot.lane.b32.xlu0 %v3078_v63, %s4127_s30  ;;  %v3090_v2 = vadd.f32 %v3078_v63, %v4925_v55  ;;  %v3140_v3 = vrot.slane %v3056_v60, 6  ;;  %3061 = vst.msk [vmem:[%s4930_s3] sm:$0x1] %vm3060_vm0, %v3059_v59  ;;  %v3155_v44 = vrot.slane %v3056_v60, 7 }
 0xb7b   : > { %v3125_v6 = vrot.slane %v3056_v60, 5  ;;  %v3101_v27 = vadd.f32 %v3093_v23, %v4925_v55  ;;  %v3071_v15 = vadd.f32 %v3063_v35, %v4925_v55 }
 0xb7c   : > { %v3122_v4 = vadd.f32 %v3120_v0, %v4925_v55  ;;  %3092 = vst.msk [vmem:[%s4930_s3 - $0x1] sm:$0x4] %vm3091_vm12, %v3090_v2  ;;  %v3152_v5 = vadd.f32 %v3140_v3, %v4925_v55  ;;  %v3163_v8 = vadd.f32 %v3155_v44, %v4925_v55 }
 0xb7d   : > { %v3133_v21 = vadd.f32 %v3125_v6, %v4925_v55 }
 0xb7e   : > { %3170 = vrot.lane.b32.xlu1 %v3056_v60, %s4127_s30  ;;  %3141 = vrot.lane.b32.xlu0 %v3140_v3, %s4127_s30  ;;  %3154 = vst.msk [vmem:[%s4930_s3 - $0x3] sm:$0x40] %vm3153_vm13, %v3152_v5 }
 0xb7f   : > { %3124 = vst.msk [vmem:[%s4930_s3 - $0x2] sm:$0x10] %vm3123_vm14, %v3122_v4 }
 0xb82   : > { %3094 = vrot.lane.b32.xlu1 %v3093_v23, %s4127_s30  ;;  %3064 = vrot.lane.b32.xlu0 %v3063_v35, %s4127_s30 }
 0xb86   : > { %3156 = vrot.lane.b32.xlu1 %v3155_v44, %s4127_s30  ;;  %3126 = vrot.lane.b32.xlu0 %v3125_v6, %s4127_s30 }
 0xb8a   : > { %3103 = vrot.lane.b32.xlu1 %v3101_v27, %s4128_s0  ;;  %3073 = vrot.lane.b32.xlu0 %v3071_v15, %s4128_s0 }
 0xb8e   : > { %3165 = vrot.lane.b32.xlu1 %v3163_v8, %s4128_s0  ;;  %3135 = vrot.lane.b32.xlu0 %v3133_v21, %s4128_s0 }
 0xbec   : > { %v3110_v9 = vpop.permute.xlu1 %3109  ;;  %v3080_v11 = vpop.permute.xlu0 %3079 }
 0xbed   : > { %v3112_v10 = vadd.f32 %v3110_v9, %v4925_v55  ;;  %v3082_v13 = vadd.f32 %v3080_v11, %v4925_v55 }
 0xbef   : > { %3114 = vrot.lane.b32.xlu1 %v3112_v10, %s4128_s0  ;;  %3084 = vrot.lane.b32.xlu0 %v3082_v13, %s4128_s0 }
 0xbf0   : > { %v3171_v14 = vpop.permute.xlu1 %3170  ;;  %v3142_v16 = vpop.permute.xlu0 %3141 }
 0xbf1   : > { %v3173_v17 = vadd.f32 %v3171_v14, %v4925_v55  ;;  %v3144_v18 = vadd.f32 %v3142_v16, %v4925_v55 }
 0xbf3   : > { %3175 = vrot.lane.b32.xlu1 %v3173_v17, %s4128_s0  ;;  %3146 = vrot.lane.b32.xlu0 %v3144_v18, %s4128_s0 }
 0xbf4   : > { %v3095_v19 = vpop.permute.xlu1 %3094  ;;  %v3065_v20 = vpop.permute.xlu0 %3064 }
 0xbf5   : > { %v3097_v22 = vadd.f32 %v3095_v19, %v4925_v55  ;;  %v3067_v24 = vadd.f32 %v3065_v20, %v4925_v55 }
 0xbf7   : > { %3099 = vst.msk [vmem:[%s4930_s3 - $0x1] sm:$0x4] %vm3098_vm15, %v3097_v22 }
 0xbf8   : > { %3069 = vst.msk [vmem:[%s4930_s3] sm:$0x1] %vm3068_vm1, %v3067_v24  ;;  %v3157_v25 = vpop.permute.xlu1 %3156  ;;  %v3127_v26 = vpop.permute.xlu0 %3126 }
 0xbf9   : > { %v3159_v28 = vadd.f32 %v3157_v25, %v4925_v55  ;;  %v3129_v30 = vadd.f32 %v3127_v26, %v4925_v55 }
 0xbfb   : > { %3161 = vst.msk [vmem:[%s4930_s3 - $0x3] sm:$0x40] %vm3160_vm2, %v3159_v28 }
 0xbfc   : > { %3131 = vst.msk [vmem:[%s4930_s3 - $0x2] sm:$0x10] %vm3130_vm3, %v3129_v30  ;;  %v3104_v31 = vpop.permute.xlu1 %3103  ;;  %v3074_v32 = vpop.permute.xlu0 %3073 }
 0xbfd   : > { %3107 = vst.msk [vmem:[%s4930_s3 - $0x2] sm:$0x8] %vm3106_vm4, %v3104_v31 }
 0xbfe   : > { %3077 = vst.msk [vmem:[%s4930_s3 - $0x1] sm:$0x2] %vm3076_vm5, %v3074_v32 }
 0xc00   : > { %v3166_v33 = vpop.permute.xlu1 %3165  ;;  %v3136_v34 = vpop.permute.xlu0 %3135 }
 0xc01   : > { %3169 = vst.msk [vmem:[%s4930_s3 - $0x4] sm:$0x80] %vm3168_vm6, %v3166_v33 }
 0xc02   : > { %3139 = vst.msk [vmem:[%s4930_s3 - $0x3] sm:$0x20] %vm3138_vm8, %v3136_v34 }
 0xc61   : > { %v3115_v36 = vpop.permute.xlu1 %3114  ;;  %v3085_v29 = vpop.permute.xlu0 %3084 }
 0xc62   : > { %3118 = vst.msk [vmem:[%s4930_s3 - $0x2] sm:$0x8] %vm3117_vm7, %v3115_v36 }
 0xc63   : > { %3088 = vst.msk [vmem:[%s4930_s3 - $0x1] sm:$0x2] %vm3087_vm9, %v3085_v29 }
 0xc65   : > { %v3176_v37 = vpop.permute.xlu1 %3175  ;;  %v3147_v12 = vpop.permute.xlu0 %3146 }
 0xc66   : > { %3179 = vst.msk [vmem:[%s4930_s3 - $0x4] sm:$0x80] %vm3178_vm10, %v3176_v37 }
 0xc67   : > { %3150 = vst.msk [vmem:[%s4930_s3 - $0x3] sm:$0x20] %vm3149_vm11, %v3147_v12 }
 0xc68 PF: > { %s33_s4 = sadd.s32 1, %s4120_s4  }
 0xc69   : > { %p30_p4 = scmp.ge.s32.totalorder %s33_s4, 4  }
 0xc6b   :  { %32 = sbr.rel (!%p30_p4) target bundleno = 9 (0x9), region = 154 }

</bundles_post_ra>
